<compile_context>
chip_gen: v6e
topology: v6e:2x2x1
jax: 0.10.0
libtpu: 0.0.40
codegen_flags: <defaults>
</compile_context>

<pallas_src>
import functools

import numpy as np
import jax
import jax.numpy as jnp
from jax.experimental import pallas as pl
from jax.experimental.pallas import tpu as pltpu


def _round_up(x, m):
    return ((x + m - 1) // m) * m


def _default_vmem_limit():
    # Generation-aware scoped-VMEM budget: ~3/4 of physical, capped at 96 MiB
    # (v5e/v6e: 128 MiB physical; v7x: 64 MiB per TensorCore -> ~48 MiB budget).
    try:
        cap = int(pltpu.get_tpu_info().vmem_capacity_bytes)
        return max(32 * 1024 * 1024, min(96 * 1024 * 1024, (cap * 3) // 4))
    except Exception:
        return 48 * 1024 * 1024


_VMEM_LIMIT = _default_vmem_limit()


# ----------------------------------------------------------------------------
# Pallas kernels
# ----------------------------------------------------------------------------
def _mm_kernel(a_ref, b_ref, c_ref, *rest, relu, has_residual):
    """out = relu?(A @ B + shift [+ residual]).  Grid = (M, N, K) tiles, K last."""
    if has_residual:
        r_ref, o_ref, acc_ref = rest
    else:
        o_ref, acc_ref = rest

    @pl.when(pl.program_id(2) == 0)
    def _init():
        acc_ref[...] = jnp.zeros_like(acc_ref)

    acc_ref[...] += jnp.dot(a_ref[...], b_ref[...],
                            preferred_element_type=jnp.float32)

    @pl.when(pl.program_id(2) == pl.num_programs(2) - 1)
    def _finalize():
        y = acc_ref[...] + c_ref[...]              # f32 epilogue (v5e has no bf16 VPU)
        if has_residual:
            y = y + r_ref[...].astype(jnp.float32)
        if relu:
            y = jnp.maximum(y, 0.0)
        o_ref[...] = y.astype(o_ref.dtype)


def _conv3x3_kernel(x_ref, w_ref, b_ref, o_ref, acc_ref, *, wp, m_full, relu):
    """3x3 / stride-1 / pad-1 conv as 9 tap-matmuls over a flattened padded image.

    x_ref : (1, L, C)            flattened zero-padded rows of one image (bf16)
    w_ref : (9, C, O)            BN-folded weights, tap-major (bf16)
    b_ref : (1, O)               f32 shift
    o_ref : (1, OH*Wp, O)        "full-width" output rows (2 junk cols per image row,
                                  stripped by the caller)
    For tap (dh, dw) the A operand is the contiguous row window [t, t + OH*Wp) of the
    flat slab with t = dh*Wp + dw, so no im2col patches are ever materialized.
    """
    for dh in range(3):
        for dw in range(3):
            t = dh * wp + dw
            p = jnp.dot(x_ref[0, t:t + m_full, :], w_ref[dh * 3 + dw],
                        preferred_element_type=jnp.float32)
            if dh == 0 and dw == 0:
                acc_ref[...] = p
            else:
                acc_ref[...] += p
    y = acc_ref[...] + b_ref[...]
    if relu:
        y = jnp.maximum(y, 0.0)
    o_ref[0] = y.astype(o_ref.dtype)


def _avg_kernel(x_ref, o_ref):
    # x: (spatial, nc_tile) bf16 -> f32 mean over the spatial axis
    o_ref[...] = jnp.mean(x_ref[...].astype(jnp.float32), axis=0, keepdims=True)


# ----------------------------------------------------------------------------
# Tile heuristics (exact divisors / full dims -> no pad+slice round trips)
# ----------------------------------------------------------------------------
def _pick_tm(M, cap=1024):
    """Return (padded_M, tile): tile divides padded_M; tile == M (full) or tile % 8 == 0."""
    if M <= cap:
        return M, M
    d = cap
    while d >= 8:
        if M % d == 0:
            return M, d
        d -= 8
    return _round_up(M, 512), 512          # rare fallback: zero-pad rows


def _pick_tk(K, cap=1024):
    if K <= cap:
        return K
    for d in range(cap, 127, -128):
        if K % d == 0:
            return d
    return K


def _pick_tn(N, cap=256):
    if N <= cap:
        return N
    for d in (256, 128):
        if N % d == 0:
            return d
    return N


# ----------------------------------------------------------------------------
# pallas_call builders (memoized on static shapes so kernels are reused)
# ----------------------------------------------------------------------------
@functools.lru_cache(maxsize=None)
def _build_mm(M, K, N, tm, tk, tn, relu, has_residual, out_dtype):
    kernel = functools.partial(_mm_kernel, relu=relu, has_residual=has_residual)
    in_specs = [
        pl.BlockSpec((tm, tk), lambda i, j, k: (i, k)),
        pl.BlockSpec((tk, tn), lambda i, j, k: (k, j)),
        pl.BlockSpec((1, tn), lambda i, j, k: (0, j)),
    ]
    if has_residual:
        in_specs.append(pl.BlockSpec((tm, tn), lambda i, j, k: (i, j)))
    return pl.pallas_call(
        kernel,
        out_shape=jax.ShapeDtypeStruct((M, N), out_dtype),
        grid_spec=pltpu.PrefetchScalarGridSpec(
            num_scalar_prefetch=0,
            grid=(M // tm, N // tn, K // tk),
            in_specs=in_specs,
            out_specs=pl.BlockSpec((tm, tn), lambda i, j, k: (i, j)),
            scratch_shapes=[pltpu.VMEM((tm, tn), jnp.float32)],
        ),
        compiler_params=pltpu.CompilerParams(
            dimension_semantics=("parallel", "parallel", "arbitrary"),
            vmem_limit_bytes=_VMEM_LIMIT),
    )


@functools.lru_cache(maxsize=None)
def _build_conv3(NB, L, C, O, wp, m_full, relu):
    kernel = functools.partial(_conv3x3_kernel, wp=wp, m_full=m_full, relu=relu)
    return pl.pallas_call(
        kernel,
        out_shape=jax.ShapeDtypeStruct((NB, m_full, O), jnp.bfloat16),
        grid_spec=pltpu.PrefetchScalarGridSpec(
            num_scalar_prefetch=0,
            grid=(NB,),
            in_specs=[
                pl.BlockSpec((1, L, C), lambda n: (n, 0, 0)),
                pl.BlockSpec((9, C, O), lambda n: (0, 0, 0)),
                pl.BlockSpec((1, O), lambda n: (0, 0)),
            ],
            out_specs=pl.BlockSpec((1, m_full, O), lambda n: (n, 0, 0)),
            scratch_shapes=[pltpu.VMEM((m_full, O), jnp.float32)],
        ),
        compiler_params=pltpu.CompilerParams(
            dimension_semantics=("parallel",),
            vmem_limit_bytes=_VMEM_LIMIT),
    )


@functools.lru_cache(maxsize=None)
def _build_avg(S, NC, tc):
    return pl.pallas_call(
        _avg_kernel,
        out_shape=jax.ShapeDtypeStruct((1, NC), jnp.float32),
        grid_spec=pltpu.PrefetchScalarGridSpec(
            num_scalar_prefetch=0,
            grid=(NC // tc,),
            in_specs=[pl.BlockSpec((S, tc), lambda i: (0, i))],
            out_specs=pl.BlockSpec((1, tc), lambda i: (0, i)),
        ),
        compiler_params=pltpu.CompilerParams(
            dimension_semantics=("parallel",),
            vmem_limit_bytes=_VMEM_LIMIT),
    )


# ----------------------------------------------------------------------------
# Wrappers (glue: layout plumbing in plain JAX, compute in Pallas)
# ----------------------------------------------------------------------------
def matmul_bias_act(a, b, bias, relu, residual=None, out_dtype=jnp.bfloat16):
    """relu?(a @ b + bias [+ residual]); bf16 operands, f32 MXU accumulation.

    `b` is a pre-folded bf16 weight whose K dim is already 128-aligned; only `a` may
    need a (small, stem / 64-channel-layer only) zero-pad on its last dim.
    """
    M, K = a.shape
    Kb, N = b.shape
    a = a.astype(jnp.bfloat16)
    if Kb != K:
        a = jnp.pad(a, ((0, 0), (0, Kb - K)))
    Mp, tm = _pick_tm(M)
    tk = _pick_tk(Kb)
    tn = _pick_tn(N)
    if Mp != M:                                   # rare fallback path
        a = jnp.pad(a, ((0, Mp - M), (0, 0)))
    args = [a, b.astype(jnp.bfloat16), bias.reshape(1, N).astype(jnp.float32)]
    has_res = residual is not None
    if has_res:
        r = residual.astype(jnp.bfloat16)
        if Mp != M:
            r = jnp.pad(r, ((0, Mp - M), (0, 0)))
        args.append(r)
    out = _build_mm(Mp, Kb, N, tm, tk, tn, bool(relu), has_res, out_dtype)(*args)
    return out if Mp == M else out[:M]


def _im2col(x, kh, kw, stride, pad):
    """NHWC -> (N*OH*OW, kh*kw*C) patches (PyTorch Conv2d semantics)."""
    N, H, W, C = x.shape
    xp = jnp.pad(x, ((0, 0), (pad, pad), (pad, pad), (0, 0)))
    OH = (H + 2 * pad - kh) // stride + 1
    OW = (W + 2 * pad - kw) // stride + 1
    cols = []
    for dh in range(kh):
        for dw in range(kw):
            cols.append(xp[:, dh:dh + stride * OH:stride,
                           dw:dw + stride * OW:stride, :])
    patches = jnp.stack(cols, axis=3)             # (N, OH, OW, kh*kw, C)
    return patches.reshape(N * OH * OW, kh * kw * C), OH, OW


def conv_matmul(x, wm, bias, kh, kw, stride, pad, relu, residual=None):
    """Conv (1x1 or im2col) + folded BN + optional fused residual & ReLU."""
    N, H, W, C = x.shape
    O = wm.shape[1]
    if kh == 1 and kw == 1 and pad == 0:
        # TODO(synk): fold the stride-2 row selection into the matmul A BlockSpec
        # instead of this XLA strided-slice gather (3 downsample branches only).
        xs = x if stride == 1 else x[:, ::stride, ::stride, :]
        OH, OW = xs.shape[1], xs.shape[2]
        cols = xs.reshape(N * OH * OW, C)
    else:
        # TODO(synk): the 7x7 stem and the 3 stride-2 3x3 convs still materialize
        # im2col patches; all stride-1 3x3 convs use the implicit-GEMM kernel below.
        cols, OH, OW = _im2col(x, kh, kw, stride, pad)
    res2d = None if residual is None else residual.reshape(N * OH * OW, O)
    y = matmul_bias_act(cols, wm, bias, relu, residual=res2d)
    return y.reshape(N, OH, OW, O)


def conv3x3_s1(x, wm_taps, bias, relu=True):
    """3x3 / stride-1 / pad-1 conv + folded BN (+ReLU) without im2col materialization."""
    N, H, W, C = x.shape
    Cp, O = wm_taps.shape[1], wm_taps.shape[2]
    OH, OW = H, W
    Wp = W + 2
    # One fused pad: spatial zero padding (1 top/left/right, 2 bottom rows -- the extra
    # row supplies the flat-row slack the last taps need) plus channel padding up to the
    # weights' 128-aligned C (zeros x zeros contribute nothing to the contraction).
    xp = jnp.pad(x, ((0, 0), (1, 2), (1, 1), (0, Cp - C)))
    L = (H + 3) * Wp
    xf = xp.reshape(N, L, Cp)
    m_full = OH * Wp
    out = _build_conv3(N, L, Cp, O, Wp, m_full, bool(relu))(
        xf, wm_taps, bias.reshape(1, O).astype(jnp.float32))
    # Strip the 2 wrap-around junk columns of every output row.
    return out.reshape(N, OH, Wp, O)[:, :, :OW, :]


def maxpool_3x3_s2(x):
    """3x3 / stride-2 / pad-1 max pool as a two-stage shifted max (plain JAX memory
    re-org; replaces the previous 9x window-stack materialization)."""
    N, H, W, C = x.shape
    OH = (H - 1) // 2 + 1
    OW = (W - 1) // 2 + 1
    xp = jnp.pad(x, ((0, 0), (1, 1), (1, 1), (0, 0)),
                 constant_values=float("-inf"))
    c = jnp.maximum(jnp.maximum(xp[:, :, 0:2 * OW:2, :],
                                xp[:, :, 1:1 + 2 * OW:2, :]),
                    xp[:, :, 2:2 + 2 * OW:2, :])
    r = jnp.maximum(jnp.maximum(c[:, 0:2 * OH:2, :, :],
                                c[:, 1:1 + 2 * OH:2, :, :]),
                    c[:, 2:2 + 2 * OH:2, :, :])
    return r


def global_avgpool(x):
    N, H, W, C = x.shape
    S, NC = H * W, N * C
    xr = jnp.transpose(x, (1, 2, 0, 3)).reshape(S, NC)
    NCp = _round_up(NC, 128)
    if NCp != NC:
        xr = jnp.pad(xr, ((0, 0), (0, NCp - NC)))
    tc = 128
    for c in (2048, 1024, 512, 256, 128):
        if NCp % c == 0:
            tc = c
            break
    out = _build_avg(S, NCp, tc)(xr)
    return out[0, :NC].reshape(N, C)


# ----------------------------------------------------------------------------
# Parameter construction: synthetic weights, BN folded once at build time
# ----------------------------------------------------------------------------
class _KeyGen:
    def __init__(self, key):
        self._key = key
        self._i = 0

    def __call__(self):
        self._i += 1
        return jax.random.fold_in(self._key, self._i)


def _conv_bn(kg, out_ch, in_ch, kh, kw, taps, eps=1e-5):
    """Random Conv2d + BatchNorm params, folded (in f32) into inference form:
    bf16 weights with the BN scale in the output columns, plus an f32 shift."""
    fan_in = in_ch * kh * kw
    w = (jax.random.normal(kg(), (out_ch, in_ch, kh, kw), jnp.float32)
         * np.sqrt(2.0 / fan_in))
    gamma = 1.0 + 0.1 * jax.random.normal(kg(), (out_ch,), jnp.float32)
    beta = 0.1 * jax.random.normal(kg(), (out_ch,), jnp.float32)
    mean = 0.1 * jax.random.normal(kg(), (out_ch,), jnp.float32)
    var = 1.0 + 0.1 * jax.random.uniform(kg(), (out_ch,), jnp.float32)
    scale = gamma / jnp.sqrt(var + eps)
    shift = (beta - scale * mean).astype(jnp.float32)
    wf = jnp.transpose(w, (2, 3, 1, 0)) * scale            # (KH, KW, I, O), f32 fold
    if taps:                                               # (9, Cp, O), tap-major
        cp = _round_up(in_ch, 128)
        wf = jnp.pad(wf, ((0, 0), (0, 0), (0, cp - in_ch), (0, 0)))
        wm = wf.reshape(kh * kw, cp, out_ch)
    else:                                                  # (Kp, O) matrix, K 128-aligned
        k = kh * kw * in_ch
        wm = wf.reshape(k, out_ch)
        kp = _round_up(k, 128)
        if kp != k:
            wm = jnp.pad(wm, ((0, kp - k), (0, 0)))
    return wm.astype(jnp.bfloat16), shift


def make_resnet50_params(num_class, key):
    kg = _KeyGen(key)
    stem_w, stem_b = _conv_bn(kg, 64, 3, 7, 7, taps=False)
    params = {"stem_w": stem_w, "stem_b": stem_b}
    layers = []
    in_ch = 64
    cfg = [(64, 3, 1), (128, 4, 2), (256, 6, 2), (512, 3, 2)]  # (width, blocks, stride)
    for width, nblocks, stride in cfg:
        blocks = []
        for b in range(nblocks):
            s = stride if b == 0 else 1
            w1, b1 = _conv_bn(kg, width, in_ch, 1, 1, taps=False)
            w2, b2 = _conv_bn(kg, width, width, 3, 3, taps=(s == 1))
            w3, b3 = _conv_bn(kg, width * 4, width, 1, 1, taps=False)
            blk = {"w1": w1, "b1": b1, "w2": w2, "b2": b2,
                   "w3": w3, "b3": b3, "stride": s}
            if b == 0:  # downsample branch (1x1 conv, stride s) + folded BN
                dw, db = _conv_bn(kg, width * 4, in_ch, 1, 1, taps=False)
                blk["down_w"], blk["down_b"] = dw, db
            blocks.append(blk)
            in_ch = width * 4
        layers.append(blocks)
    params["layers"] = layers
    fc_w = (jax.random.normal(kg(), (num_class, 2048), jnp.float32)
            * np.sqrt(1.0 / 2048))
    params["fc_w"] = jnp.transpose(fc_w).astype(jnp.bfloat16)   # (2048, num_class)
    params["fc_b"] = 0.01 * jax.random.normal(kg(), (num_class,), jnp.float32)
    return params


# ----------------------------------------------------------------------------
# Forward pass (inference semantics of torchvision resnet50 with replaced fc)
# ----------------------------------------------------------------------------
def _bottleneck(x, blk):
    s = blk["stride"]
    if "down_w" in blk:
        identity = conv_matmul(x, blk["down_w"], blk["down_b"], 1, 1, s, 0, relu=False)
    else:
        identity = x
    out = conv_matmul(x, blk["w1"], blk["b1"], 1, 1, 1, 0, relu=True)
    if s == 1:
        out = conv3x3_s1(out, blk["w2"], blk["b2"], relu=True)
    else:
        out = conv_matmul(out, blk["w2"], blk["b2"], 3, 3, s, 1, relu=True)
    # conv3 + folded BN + residual add + ReLU fused in a single matmul epilogue.
    out = conv_matmul(out, blk["w3"], blk["b3"], 1, 1, 1, 0, relu=True,
                      residual=identity)
    return out


def resnet50_forward(params, x_nchw):
    # External interface is NCHW (PyTorch); convert once to NHWC bf16.
    x = jnp.transpose(x_nchw, (0, 2, 3, 1)).astype(jnp.bfloat16)
    x = conv_matmul(x, params["stem_w"], params["stem_b"], 7, 7, 2, 3, relu=True)
    x = maxpool_3x3_s2(x)
    for blocks in params["layers"]:
        for blk in blocks:
            x = _bottleneck(x, blk)
    feat = global_avgpool(x)                      # (N, 2048) f32
    logits = matmul_bias_act(feat, params["fc_w"], params["fc_b"],
                             relu=False, out_dtype=jnp.float32)
    return logits


# ----------------------------------------------------------------------------
if __name__ == "__main__":
    num_class = 5
    key = jax.random.PRNGKey(0)
    params = make_resnet50_params(num_class, key)

    # Small but valid ResNet-50 input: batch=2, 3 channels, 32x32 spatial (NCHW).
    x = jax.random.normal(jax.random.fold_in(key, 9999), (2, 3, 32, 32), jnp.float32)

    logits = resnet50_forward(params, x)
    logits = jax.block_until_ready(logits)
    assert logits.shape == (2, num_class), logits.shape
    assert bool(jnp.all(jnp.isfinite(logits)))
    print("KERNEL_OK")
</pallas_src>

<mosaic_0001>
module attributes {stable_mosaic.version = 11 : i64} {
  func.func @_mm_kernel(%arg0: i32, %arg1: i32, %arg2: i32, %arg3: memref<512x256xbf16, #tpu.memory_space<vmem>>, %arg4: memref<256x64xbf16, #tpu.memory_space<vmem>>, %arg5: memref<1x64xf32, #tpu.memory_space<vmem>>, %arg6: memref<512x64xbf16, #tpu.memory_space<vmem>>, %arg7: memref<512x64xf32, #tpu.memory_space<vmem>>) attributes {dimension_semantics = [#tpu.dimension_semantics<parallel>, #tpu.dimension_semantics<parallel>, #tpu.dimension_semantics<arbitrary>], iteration_bounds = array<i64: 1, 1, 1>, scalar_prefetch = 0 : i64, scratch_operands = 1 : i64, tpu.core_type = #tpu.core_type<tc>, window_params = [{transform_indices = @transform_0, window_bounds = array<i64: 512, 256>}, {transform_indices = @transform_1, window_bounds = array<i64: 256, 64>}, {transform_indices = @transform_2, window_bounds = array<i64: 1, 64>}, {transform_indices = @transform_3, window_bounds = array<i64: 512, 64>}]} {
    %c0_i32 = arith.constant 0 : i32
    %0 = arith.cmpi eq, %arg2, %c0_i32 : i32
    %1 = arith.extui %0 : i1 to i32
    %c0_i32_0 = arith.constant 0 : i32
    %2 = arith.cmpi ne, %1, %c0_i32_0 : i32
    scf.if %2 {
      %cst_10 = arith.constant 0.000000e+00 : f32
      %12 = vector.broadcast %cst_10 : f32 to vector<512x64xf32>
      %c0_11 = arith.constant 0 : index
      %c0_12 = arith.constant 0 : index
      %13 = vector.load %arg7[%c0_11, %c0_12] : memref<512x64xf32, #tpu.memory_space<vmem>>, vector<512x64xf32>
      tpu.vector_store %arg7[%c0_11, %c0_12], %12 {strides = array<i32>} : memref<512x64xf32, #tpu.memory_space<vmem>>, vector<512x64xf32>,
    } else {
    }
    %c0 = arith.constant 0 : index
    %c0_1 = arith.constant 0 : index
    %3 = vector.load %arg7[%c0, %c0_1] : memref<512x64xf32, #tpu.memory_space<vmem>>, vector<512x64xf32>
    %c0_2 = arith.constant 0 : index
    %c0_3 = arith.constant 0 : index
    %4 = vector.load %arg3[%c0_2, %c0_3] : memref<512x256xbf16, #tpu.memory_space<vmem>>, vector<512x256xbf16>
    %c0_4 = arith.constant 0 : index
    %c0_5 = arith.constant 0 : index
    %5 = vector.load %arg4[%c0_4, %c0_5] : memref<256x64xbf16, #tpu.memory_space<vmem>>, vector<256x64xbf16>
    %cst = arith.constant dense<0.000000e+00> : vector<512x64xf32>
    %6 = tpu.matmul %4, %5, %cst {dimension_numbers = #tpu.dot_dimension_numbers<[1], [0], [0], [1], [0, 0, 1, 1], [], []>} : vector<512x256xbf16>, vector<256x64xbf16>, vector<512x64xf32> -> vector<512x64xf32>
    %7 = arith.addf %3, %6 : vector<512x64xf32>
    %c0_6 = arith.constant 0 : index
    %c0_7 = arith.constant 0 : index
    %8 = vector.load %arg7[%c0_6, %c0_7] : memref<512x64xf32, #tpu.memory_space<vmem>>, vector<512x64xf32>
    tpu.vector_store %arg7[%c0_6, %c0_7], %7 {strides = array<i32>} : memref<512x64xf32, #tpu.memory_space<vmem>>, vector<512x64xf32>,
    %c0_i32_8 = arith.constant 0 : i32
    %9 = arith.cmpi eq, %arg2, %c0_i32_8 : i32
    %10 = arith.extui %9 : i1 to i32
    %c0_i32_9 = arith.constant 0 : i32
    %11 = arith.cmpi ne, %10, %c0_i32_9 : i32
    scf.if %11 {
      %c0_10 = arith.constant 0 : index
      %c0_11 = arith.constant 0 : index
      %12 = vector.load %arg7[%c0_10, %c0_11] : memref<512x64xf32, #tpu.memory_space<vmem>>, vector<512x64xf32>
      %c0_12 = arith.constant 0 : index
      %c0_13 = arith.constant 0 : index
      %13 = vector.load %arg5[%c0_12, %c0_13] : memref<1x64xf32, #tpu.memory_space<vmem>>, vector<1x64xf32>
      %14 = vector.broadcast %13 : vector<1x64xf32> to vector<512x64xf32>
      %15 = arith.addf %12, %14 : vector<512x64xf32>
      %cst_14 = arith.constant 0.000000e+00 : f32
      %16 = vector.broadcast %cst_14 : f32 to vector<512x64xf32>
      %17 = arith.maximumf %15, %16 : vector<512x64xf32>
      %18 = arith.truncf %17 : vector<512x64xf32> to vector<512x64xbf16>
      %c0_15 = arith.constant 0 : index
      %c0_16 = arith.constant 0 : index
      %19 = vector.load %arg6[%c0_15, %c0_16] : memref<512x64xbf16, #tpu.memory_space<vmem>>, vector<512x64xbf16>
      tpu.vector_store %arg6[%c0_15, %c0_16], %18 {strides = array<i32>} : memref<512x64xbf16, #tpu.memory_space<vmem>>, vector<512x64xbf16>,
    } else {
    }
    return
  }
  func.func @transform_0(%arg0: i32, %arg1: i32, %arg2: i32) -> (i32, i32) {
    %c0_i32 = arith.constant 0 : i32
    return %arg0, %arg2 : i32, i32
  }
  func.func @transform_1(%arg0: i32, %arg1: i32, %arg2: i32) -> (i32, i32) {
    %c0_i32 = arith.constant 0 : i32
    return %arg2, %arg1 : i32, i32
  }
  func.func @transform_2(%arg0: i32, %arg1: i32, %arg2: i32) -> (i32, i32) {
    %c0_i32 = arith.constant 0 : i32
    %c0_i32_0 = arith.constant 0 : i32
    return %c0_i32, %arg1 : i32, i32
  }
  func.func @transform_3(%arg0: i32, %arg1: i32, %arg2: i32) -> (i32, i32) {
    %c0_i32 = arith.constant 0 : i32
    return %arg0, %arg1 : i32, i32
  }
}

</mosaic_0001>

<bundles_post_ra>
// kernel: tpu_custom_call.1
= control target key start
LH: loop header
LB: loop body
LE: loop exit
PB: predicated region body
PF: predicated region fallthrough
CT: control target
= control target key end

     0   :  { %8 = vsyncpa [#allocation4], 0  ;;  %s2001_s12 = smov [#allocation3]   ;;  %s2635_s0 = inlined_call_operand.hbm [shape: bf16[512,256], index: 0, kind: input, shape index: {}]   ;;  %s2636_s1 = inlined_call_operand.vmem [shape: bf16[256,64], index: 1, kind: input, shape index: {}]   ;;  %s2637_s2 = inlined_call_operand.vmem [shape: f32[1,64], index: 2, kind: input, shape index: {}]   ;;  %s2638_s3 = inlined_call_operand.vmem [shape: bf16[512,64], index: 3, kind: output, shape index: {}]  }
   0x1   :  { %s14_s13 = sshll.u32 %s2001_s12, 4  ;;  %s15_s13 = int_to_ptr.vmem [resolvable:$true] %s14_s13 }
   0x2   :  { %s1987_s14 = scalar_lea.vmem %s15_s13, 8192  ;;  %p1992_p1 = scmp.lt.s32.totalorder %s15_s13, %s15_s13 }
   0x3   :  { %p1988_p0 = scmp.ne.s32.totalorder %s15_s13, %s1987_s14  ;;  %p1993_p2 = scmp.lt.s32.totalorder %s1987_s14, %s1987_s14 }
   0x5   :  { %p1994_p3 = por %p1993_p2, %p1992_p1 }
   0x7   :  { %p1995_p4 = pnand %p1994_p3, %p1988_p0 }
   0x9   :  { %1998 = shalt.err (!%p1995_p4)
}
   0xa   :  { %s2002_s15 = smov 128   ;;  %s2003_s16 = smov 8  }
   0xb   :  { %20 = dma.hbm_to_vmem [thread:$0]  %s2635_s0, 8192, %s15_s13, [#allocation4], %s2002_s15, %s2002_s15, %s2003_s16  }
   0xc   :  { %1999 = dma.done.wait [#allocation4], 8192  }
   0xd   :  { %2000 = vsyncadd [#allocation4], 4294959104  ;;  %v2004_v0 = vmov 0   ;;  %v1866_v1 = vld [vmem:[%s2636_s1 + $0x38] sm:$0xff]   ;;  %v1867_v2 = vld [vmem:[%s2636_s1 + $0x30] sm:$0xff]   ;;  %vm33_vm0 = vcmask 523264  }
   0xe   :  { %674 = vmatprep.subr.bf16.mxu0 %v2004_v0  ;;  %1829 = vmatprep.subr.bf16.mxu1 %v2004_v0  ;;  %v1868_v3 = vld [vmem:[%s2636_s1 + $0x28] sm:$0xff]   ;;  %v1869_v4 = vld [vmem:[%s2636_s1 + $0x20] sm:$0xff]   ;;  %v1870_v5 = vld [vmem:[%s2636_s1 + $0x18] sm:$0xff]   ;;  %v2005_v19 = vmov 0.0   ;;  %vm1550_vm1 = vcmask 519168  }
   0xf   :  { %675 = vmatpush1.bf16.msra.mxu0 %v1866_v1  ;;  %1845 = vmatpush1.bf16.msra.mxu1 %v1866_v1  ;;  %v1884_v6 = vld [vmem:[#allocation3 + $0x4] ss:$8 sps:$4 sm:$0xff]   ;;  %v1871_v7 = vld [vmem:[%s2636_s1 + $0x10] sm:$0xff]   ;;  %v1874_v11 = vld [vmem:[%s2636_s1 + $0x78] sm:$0xff]   ;;  %34 = vst.msk [vmem:[#allocation2] sm:$0xff] %vm33_vm0, %v2005_v19 }
  0x10   :  { %676 = vmatprep.subr.bf16.mxu0 %v2004_v0  ;;  %1830 = vmatprep.subr.bf16.mxu1 %v2004_v0  ;;  %v1887_v8 = vld [vmem:[#allocation3 + $0x104] ss:$8 sps:$4 sm:$0xff]   ;;  %v1875_v12 = vld [vmem:[%s2636_s1 + $0x70] sm:$0xff]   ;;  %v1878_v15 = vld [vmem:[%s2636_s1 + $0x58] sm:$0xff]   ;;  %35 = vst.msk [vmem:[#allocation2 + $0x8] sm:$0xff] %vm33_vm0, %v2005_v19 }
  0x11   :  { %706 = vmatprep.mubr.bf16.mxu0 %v1884_v6  ;;  %834 = vmatprep.mubr.bf16.mxu1 %v1887_v8  ;;  %v1872_v9 = vld [vmem:[%s2636_s1 + $0x8] sm:$0xff]   ;;  %v1873_v10 = vld [vmem:[%s2636_s1] sm:$0xff]   ;;  %v1879_v16 = vld [vmem:[%s2636_s1 + $0x50] sm:$0xff]   ;;  %36 = vst.msk [vmem:[#allocation2 + $0x10] sm:$0xff] %vm33_vm0, %v2005_v19 }
  0x12   :  { %v1876_v13 = vld [vmem:[%s2636_s1 + $0x68] sm:$0xff]   ;;  %v1877_v14 = vld [vmem:[%s2636_s1 + $0x60] sm:$0xff]   ;;  %37 = vst.msk [vmem:[#allocation2 + $0x18] sm:$0xff] %vm33_vm0, %v2005_v19  ;;  %38 = vst.msk [vmem:[#allocation2 + $0x20] sm:$0xff] %vm33_vm0, %v2005_v19 }
  0x13   :  { %677 = vmatpush1.bf16.msra.mxu0 %v1867_v2  ;;  %1846 = vmatpush1.bf16.msra.mxu1 %v1867_v2  ;;  %v1880_v17 = vld [vmem:[%s2636_s1 + $0x48] sm:$0xff]   ;;  %v2107_v18 = vld [vmem:[%s2636_s1 + $0x40] sm:$0xff]   ;;  %39 = vst.msk [vmem:[#allocation2 + $0x28] sm:$0xff] %vm33_vm0, %v2005_v19  ;;  %40 = vst.msk [vmem:[#allocation2 + $0x30] sm:$0xff] %vm33_vm0, %v2005_v19 }
  0x14   :  { %678 = vmatprep.subr.bf16.mxu0 %v2004_v0  ;;  %1831 = vmatprep.subr.bf16.mxu1 %v2004_v0  ;;  %41 = vst.msk [vmem:[#allocation2 + $0x38] sm:$0xff] %vm33_vm0, %v2005_v19  ;;  %42 = vst.msk [vmem:[#allocation2 + $0x40] sm:$0xff] %vm33_vm0, %v2005_v19  ;;  %v1882_v20 = vld [vmem:[#allocation3] ss:$8 sps:$4 sm:$0xff]   ;;  %v1888_v22 = vld [vmem:[#allocation3 + $0x14] ss:$8 sps:$4 sm:$0xff]  }
  0x15   :  { %43 = vst.msk [vmem:[#allocation2 + $0x48] sm:$0xff] %vm33_vm0, %v2005_v19  ;;  %44 = vst.msk [vmem:[#allocation2 + $0x50] sm:$0xff] %vm33_vm0, %v2005_v19  ;;  %v1885_v21 = vld [vmem:[#allocation3 + $0x100] ss:$8 sps:$4 sm:$0xff]   ;;  %v1890_v23 = vld [vmem:[#allocation3 + $0x114] ss:$8 sps:$4 sm:$0xff]  }
  0x16   :  { %45 = vst.msk [vmem:[#allocation2 + $0x58] sm:$0xff] %vm33_vm0, %v2005_v19  ;;  %46 = vst.msk [vmem:[#allocation2 + $0x60] sm:$0xff] %vm33_vm0, %v2005_v19  ;;  %v1892_v24 = vld [vmem:[#allocation3 + $0x10] ss:$8 sps:$4 sm:$0xff]   ;;  %v1894_v26 = vld [vmem:[#allocation3 + $0x24] ss:$8 sps:$4 sm:$0xff]  }
  0x17   :  { %679 = vmatpush1.bf16.msra.mxu0 %v1868_v3  ;;  %1847 = vmatpush1.bf16.msra.mxu1 %v1868_v3  ;;  %47 = vst.msk [vmem:[#allocation2 + $0x68] sm:$0xff] %vm33_vm0, %v2005_v19  ;;  %48 = vst.msk [vmem:[#allocation2 + $0x70] sm:$0xff] %vm33_vm0, %v2005_v19  ;;  %v1893_v25 = vld [vmem:[#allocation3 + $0x110] ss:$8 sps:$4 sm:$0xff]   ;;  %v1896_v27 = vld [vmem:[#allocation3 + $0x124] ss:$8 sps:$4 sm:$0xff]  }
  0x18   :  { %680 = vmatprep.subr.bf16.mxu0 %v2004_v0  ;;  %1832 = vmatprep.subr.bf16.mxu1 %v2004_v0  ;;  %49 = vst.msk [vmem:[#allocation2 + $0x78] sm:$0xff] %vm33_vm0, %v2005_v19  ;;  %50 = vst.msk [vmem:[#allocation2 + $0x80] sm:$0xff] %vm33_vm0, %v2005_v19  ;;  %v1898_v28 = vld [vmem:[#allocation3 + $0x20] ss:$8 sps:$4 sm:$0xff]   ;;  %v1900_v30 = vld [vmem:[#allocation3 + $0x34] ss:$8 sps:$4 sm:$0xff]  }
  0x19   :  { %51 = vst.msk [vmem:[#allocation2 + $0x88] sm:$0xff] %vm33_vm0, %v2005_v19  ;;  %52 = vst.msk [vmem:[#allocation2 + $0x90] sm:$0xff] %vm33_vm0, %v2005_v19  ;;  %v1899_v29 = vld [vmem:[#allocation3 + $0x120] ss:$8 sps:$4 sm:$0xff]   ;;  %v1902_v31 = vld [vmem:[#allocation3 + $0x134] ss:$8 sps:$4 sm:$0xff]  }
  0x1a   :  { %53 = vst.msk [vmem:[#allocation2 + $0x98] sm:$0xff] %vm33_vm0, %v2005_v19  ;;  %54 = vst.msk [vmem:[#allocation2 + $0xa0] sm:$0xff] %vm33_vm0, %v2005_v19  ;;  %v1904_v32 = vld [vmem:[#allocation3 + $0x30] ss:$8 sps:$4 sm:$0xff]   ;;  %v1906_v34 = vld [vmem:[#allocation3 + $0x44] ss:$8 sps:$4 sm:$0xff]  }
  0x1b   :  { %681 = vmatpush1.bf16.msra.mxu0 %v1869_v4  ;;  %1848 = vmatpush1.bf16.msra.mxu1 %v1869_v4  ;;  %55 = vst.msk [vmem:[#allocation2 + $0xa8] sm:$0xff] %vm33_vm0, %v2005_v19  ;;  %56 = vst.msk [vmem:[#allocation2 + $0xb0] sm:$0xff] %vm33_vm0, %v2005_v19  ;;  %v1905_v33 = vld [vmem:[#allocation3 + $0x130] ss:$8 sps:$4 sm:$0xff]   ;;  %v1908_v35 = vld [vmem:[#allocation3 + $0x144] ss:$8 sps:$4 sm:$0xff]  }
  0x1c   :  { %682 = vmatprep.subr.bf16.mxu0 %v2004_v0  ;;  %1833 = vmatprep.subr.bf16.mxu1 %v2004_v0  ;;  %57 = vst.msk [vmem:[#allocation2 + $0xb8] sm:$0xff] %vm33_vm0, %v2005_v19  ;;  %58 = vst.msk [vmem:[#allocation2 + $0xc0] sm:$0xff] %vm33_vm0, %v2005_v19  ;;  %v1910_v36 = vld [vmem:[#allocation3 + $0x40] ss:$8 sps:$4 sm:$0xff]   ;;  %v1912_v38 = vld [vmem:[#allocation3 + $0x54] ss:$8 sps:$4 sm:$0xff]  }
  0x1d   :  { %59 = vst.msk [vmem:[#allocation2 + $0xc8] sm:$0xff] %vm33_vm0, %v2005_v19  ;;  %60 = vst.msk [vmem:[#allocation2 + $0xd0] sm:$0xff] %vm33_vm0, %v2005_v19  ;;  %v1911_v37 = vld [vmem:[#allocation3 + $0x140] ss:$8 sps:$4 sm:$0xff]   ;;  %v1914_v39 = vld [vmem:[#allocation3 + $0x154] ss:$8 sps:$4 sm:$0xff]  }
  0x1e   :  { %61 = vst.msk [vmem:[#allocation2 + $0xd8] sm:$0xff] %vm33_vm0, %v2005_v19  ;;  %62 = vst.msk [vmem:[#allocation2 + $0xe0] sm:$0xff] %vm33_vm0, %v2005_v19  ;;  %v1916_v40 = vld [vmem:[#allocation3 + $0x50] ss:$8 sps:$4 sm:$0xff]   ;;  %v1918_v42 = vld [vmem:[#allocation3 + $0x64] ss:$8 sps:$4 sm:$0xff]  }
  0x1f   :  { %683 = vmatpush1.bf16.msra.mxu0 %v1870_v5  ;;  %1849 = vmatpush1.bf16.msra.mxu1 %v1870_v5  ;;  %63 = vst.msk [vmem:[#allocation2 + $0xe8] sm:$0xff] %vm33_vm0, %v2005_v19  ;;  %64 = vst.msk [vmem:[#allocation2 + $0xf0] sm:$0xff] %vm33_vm0, %v2005_v19  ;;  %v1917_v41 = vld [vmem:[#allocation3 + $0x150] ss:$8 sps:$4 sm:$0xff]   ;;  %v1920_v43 = vld [vmem:[#allocation3 + $0x164] ss:$8 sps:$4 sm:$0xff]  }
  0x20   :  { %684 = vmatprep.subr.bf16.mxu0 %v2004_v0  ;;  %1834 = vmatprep.subr.bf16.mxu1 %v2004_v0  ;;  %65 = vst.msk [vmem:[#allocation2 + $0xf8] sm:$0xff] %vm33_vm0, %v2005_v19  ;;  %66 = vst.msk [vmem:[#allocation2 + $0x100] sm:$0xff] %vm33_vm0, %v2005_v19  ;;  %v1922_v44 = vld [vmem:[#allocation3 + $0x60] ss:$8 sps:$4 sm:$0xff]   ;;  %v1924_v46 = vld [vmem:[#allocation3 + $0x74] ss:$8 sps:$4 sm:$0xff]  }
  0x21   :  { %67 = vst.msk [vmem:[#allocation2 + $0x108] sm:$0xff] %vm33_vm0, %v2005_v19  ;;  %68 = vst.msk [vmem:[#allocation2 + $0x110] sm:$0xff] %vm33_vm0, %v2005_v19  ;;  %v1923_v45 = vld [vmem:[#allocation3 + $0x160] ss:$8 sps:$4 sm:$0xff]   ;;  %v1926_v47 = vld [vmem:[#allocation3 + $0x174] ss:$8 sps:$4 sm:$0xff]  }
  0x22   :  { %69 = vst.msk [vmem:[#allocation2 + $0x118] sm:$0xff] %vm33_vm0, %v2005_v19  ;;  %70 = vst.msk [vmem:[#allocation2 + $0x120] sm:$0xff] %vm33_vm0, %v2005_v19  ;;  %v1928_v48 = vld [vmem:[#allocation3 + $0x70] ss:$8 sps:$4 sm:$0xff]   ;;  %v1930_v50 = vld [vmem:[#allocation3 + $0x84] ss:$8 sps:$4 sm:$0xff]  }
  0x23   :  { %685 = vmatpush1.bf16.msra.mxu0 %v1871_v7  ;;  %1850 = vmatpush1.bf16.msra.mxu1 %v1871_v7  ;;  %71 = vst.msk [vmem:[#allocation2 + $0x128] sm:$0xff] %vm33_vm0, %v2005_v19  ;;  %72 = vst.msk [vmem:[#allocation2 + $0x130] sm:$0xff] %vm33_vm0, %v2005_v19  ;;  %v1929_v49 = vld [vmem:[#allocation3 + $0x170] ss:$8 sps:$4 sm:$0xff]   ;;  %v1932_v51 = vld [vmem:[#allocation3 + $0x184] ss:$8 sps:$4 sm:$0xff]  }
  0x24   :  { %686 = vmatprep.subr.bf16.mxu0 %v2004_v0  ;;  %1835 = vmatprep.subr.bf16.mxu1 %v2004_v0  ;;  %73 = vst.msk [vmem:[#allocation2 + $0x138] sm:$0xff] %vm33_vm0, %v2005_v19  ;;  %74 = vst.msk [vmem:[#allocation2 + $0x140] sm:$0xff] %vm33_vm0, %v2005_v19  ;;  %v1934_v52 = vld [vmem:[#allocation3 + $0x80] ss:$8 sps:$4 sm:$0xff]   ;;  %v1936_v54 = vld [vmem:[#allocation3 + $0x94] ss:$8 sps:$4 sm:$0xff]  }
  0x25   :  { %75 = vst.msk [vmem:[#allocation2 + $0x148] sm:$0xff] %vm33_vm0, %v2005_v19  ;;  %76 = vst.msk [vmem:[#allocation2 + $0x150] sm:$0xff] %vm33_vm0, %v2005_v19  ;;  %v1935_v53 = vld [vmem:[#allocation3 + $0x180] ss:$8 sps:$4 sm:$0xff]   ;;  %v1938_v55 = vld [vmem:[#allocation3 + $0x194] ss:$8 sps:$4 sm:$0xff]  }
  0x26   :  { %77 = vst.msk [vmem:[#allocation2 + $0x158] sm:$0xff] %vm33_vm0, %v2005_v19  ;;  %78 = vst.msk [vmem:[#allocation2 + $0x160] sm:$0xff] %vm33_vm0, %v2005_v19  ;;  %v1940_v56 = vld [vmem:[#allocation3 + $0x90] ss:$8 sps:$4 sm:$0xff]   ;;  %v1942_v58 = vld [vmem:[#allocation3 + $0xa4] ss:$8 sps:$4 sm:$0xff]  }
  0x27   :  { %687 = vmatpush1.bf16.msra.mxu0 %v1872_v9  ;;  %1851 = vmatpush1.bf16.msra.mxu1 %v1872_v9  ;;  %79 = vst.msk [vmem:[#allocation2 + $0x168] sm:$0xff] %vm33_vm0, %v2005_v19  ;;  %80 = vst.msk [vmem:[#allocation2 + $0x170] sm:$0xff] %vm33_vm0, %v2005_v19  ;;  %v1941_v57 = vld [vmem:[#allocation3 + $0x190] ss:$8 sps:$4 sm:$0xff]   ;;  %v1944_v59 = vld [vmem:[#allocation3 + $0x1a4] ss:$8 sps:$4 sm:$0xff]  }
  0x28   :  { %688 = vmatprep.subr.bf16.mxu0 %v2004_v0  ;;  %1836 = vmatprep.subr.bf16.mxu1 %v2004_v0  ;;  %81 = vst.msk [vmem:[#allocation2 + $0x178] sm:$0xff] %vm33_vm0, %v2005_v19  ;;  %82 = vst.msk [vmem:[#allocation2 + $0x180] sm:$0xff] %vm33_vm0, %v2005_v19  ;;  %v1946_v60 = vld [vmem:[#allocation3 + $0xa0] ss:$8 sps:$4 sm:$0xff]   ;;  %v1948_v62 = vld [vmem:[#allocation3 + $0xb4] ss:$8 sps:$4 sm:$0xff]  }
  0x29   :  { %83 = vst.msk [vmem:[#allocation2 + $0x188] sm:$0xff] %vm33_vm0, %v2005_v19  ;;  %84 = vst.msk [vmem:[#allocation2 + $0x190] sm:$0xff] %vm33_vm0, %v2005_v19  ;;  %v1947_v61 = vld [vmem:[#allocation3 + $0x1a0] ss:$8 sps:$4 sm:$0xff]   ;;  %v1950_v63 = vld [vmem:[#allocation3 + $0x1b4] ss:$8 sps:$4 sm:$0xff]  }
  0x2a   :  { %85 = vst.msk [vmem:[#allocation2 + $0x198] sm:$0xff] %vm33_vm0, %v2005_v19  ;;  %86 = vst.msk [vmem:[#allocation2 + $0x1a0] sm:$0xff] %vm33_vm0, %v2005_v19  ;;  %v1953_v1 = vld [vmem:[#allocation3 + $0x1b0] ss:$8 sps:$4 sm:$0xff]   ;;  %v1954_v2 = vld [vmem:[#allocation3 + $0xc4] ss:$8 sps:$4 sm:$0xff]  }
  0x2b   :  { %689 = vmatpush1.bf16.msra.mxu0 %v1873_v10  ;;  %1852 = vmatpush1.bf16.msra.mxu1 %v1873_v10  ;;  %87 = vst.msk [vmem:[#allocation2 + $0x1a8] sm:$0xff] %vm33_vm0, %v2005_v19  ;;  %88 = vst.msk [vmem:[#allocation2 + $0x1b0] sm:$0xff] %vm33_vm0, %v2005_v19  ;;  %v1956_v3 = vld [vmem:[#allocation3 + $0x1c4] ss:$8 sps:$4 sm:$0xff]   ;;  %v1958_v4 = vld [vmem:[#allocation3 + $0xc0] ss:$8 sps:$4 sm:$0xff]  }
  0x2c   :  { %690 = vmatprep.subr.bf16.mxu0 %v2004_v0  ;;  %1837 = vmatprep.subr.bf16.mxu1 %v2004_v0  ;;  %89 = vst.msk [vmem:[#allocation2 + $0x1b8] sm:$0xff] %vm33_vm0, %v2005_v19  ;;  %90 = vst.msk [vmem:[#allocation2 + $0x1c0] sm:$0xff] %vm33_vm0, %v2005_v19  ;;  %v1959_v5 = vld [vmem:[#allocation3 + $0x1c0] ss:$8 sps:$4 sm:$0xff]   ;;  %v1960_v6 = vld [vmem:[#allocation3 + $0xd4] ss:$8 sps:$4 sm:$0xff]  }
  0x2d   :  { %91 = vst.msk [vmem:[#allocation2 + $0x1c8] sm:$0xff] %vm33_vm0, %v2005_v19  ;;  %92 = vst.msk [vmem:[#allocation2 + $0x1d0] sm:$0xff] %vm33_vm0, %v2005_v19  ;;  %v1962_v7 = vld [vmem:[#allocation3 + $0x1d4] ss:$8 sps:$4 sm:$0xff]   ;;  %v1964_v8 = vld [vmem:[#allocation3 + $0xd0] ss:$8 sps:$4 sm:$0xff]  }
  0x2e   :  { %93 = vst.msk [vmem:[#allocation2 + $0x1d8] sm:$0xff] %vm33_vm0, %v2005_v19  ;;  %94 = vst.msk [vmem:[#allocation2 + $0x1e0] sm:$0xff] %vm33_vm0, %v2005_v19  ;;  %v1965_v9 = vld [vmem:[#allocation3 + $0x1d0] ss:$8 sps:$4 sm:$0xff]   ;;  %v1966_v10 = vld [vmem:[#allocation3 + $0xe4] ss:$8 sps:$4 sm:$0xff]  }
  0x2f   :  { %691 = vmatpush2.bf16.msra.mxu0 %v1874_v11  ;;  %1853 = vmatpush2.bf16.msra.mxu1 %v1874_v11  ;;  %95 = vst.msk [vmem:[#allocation2 + $0x1e8] sm:$0xff] %vm33_vm0, %v2005_v19  ;;  %96 = vst.msk [vmem:[#allocation2 + $0x1f0] sm:$0xff] %vm33_vm0, %v2005_v19  ;;  %v1968_v11 = vld [vmem:[#allocation3 + $0x1e4] ss:$8 sps:$4 sm:$0xff]  }
  0x30   :  { %692 = vmatprep.subr.bf16.mxu0 %v2004_v0  ;;  %1838 = vmatprep.subr.bf16.mxu1 %v2004_v0  ;;  %97 = vst.msk [vmem:[#allocation2 + $0x1f8] sm:$0xff] %vm33_vm0, %v2005_v19  ;;  %v130_v19 = vld [vmem:[#allocation2 + $0x100] sm:$0xff] }
  0x33   :  { %693 = vmatpush2.bf16.msra.mxu0 %v1875_v12  ;;  %1854 = vmatpush2.bf16.msra.mxu1 %v1875_v12  ;;  %v1970_v12 = vld [vmem:[#allocation3 + $0xe0] ss:$8 sps:$4 sm:$0xff]  }
  0x34   :  { %694 = vmatprep.subr.bf16.mxu0 %v2004_v0  ;;  %1839 = vmatprep.subr.bf16.mxu1 %v2004_v0 }
  0x37   :  { %695 = vmatpush2.bf16.msra.mxu0 %v1876_v13  ;;  %1855 = vmatpush2.bf16.msra.mxu1 %v1876_v13  ;;  %v1971_v13 = vld [vmem:[#allocation3 + $0x1e0] ss:$8 sps:$4 sm:$0xff]  }
  0x38   :  { %696 = vmatprep.subr.bf16.mxu0 %v2004_v0  ;;  %1840 = vmatprep.subr.bf16.mxu1 %v2004_v0 }
  0x3b   :  { %697 = vmatpush2.bf16.msra.mxu0 %v1877_v14  ;;  %1856 = vmatpush2.bf16.msra.mxu1 %v1877_v14  ;;  %v1972_v14 = vld [vmem:[#allocation3 + $0xf4] ss:$8 sps:$4 sm:$0xff]  }
  0x3c   :  { %698 = vmatprep.subr.bf16.mxu0 %v2004_v0  ;;  %1841 = vmatprep.subr.bf16.mxu1 %v2004_v0 }
  0x3f   :  { %699 = vmatpush2.bf16.msra.mxu0 %v1878_v15  ;;  %1857 = vmatpush2.bf16.msra.mxu1 %v1878_v15  ;;  %v1974_v15 = vld [vmem:[#allocation3 + $0x1f4] ss:$8 sps:$4 sm:$0xff]  }
  0x40   :  { %700 = vmatprep.subr.bf16.mxu0 %v2004_v0  ;;  %1842 = vmatprep.subr.bf16.mxu1 %v2004_v0 }
  0x43   :  { %701 = vmatpush2.bf16.msra.mxu0 %v1879_v16  ;;  %1858 = vmatpush2.bf16.msra.mxu1 %v1879_v16  ;;  %v1976_v16 = vld [vmem:[#allocation3 + $0xf0] ss:$8 sps:$4 sm:$0xff]  }
  0x44   :  { %702 = vmatprep.subr.bf16.mxu0 %v2004_v0  ;;  %1843 = vmatprep.subr.bf16.mxu1 %v2004_v0 }
  0x47   :  { %703 = vmatpush2.bf16.msra.mxu0 %v1880_v17  ;;  %1859 = vmatpush2.bf16.msra.mxu1 %v1880_v17  ;;  %v1977_v17 = vld [vmem:[#allocation3 + $0x1f0] ss:$8 sps:$4 sm:$0xff]  }
  0x48   :  { %704 = vmatprep.subr.bf16.mxu0 %v2004_v0  ;;  %1844 = vmatprep.subr.bf16.mxu1 %v2004_v0  ;;  %v1952_v0 = vld [vmem:[#allocation3 + $0xb0] ss:$8 sps:$4 sm:$0xff]  }
  0x4b   :  { %705 = vmatpush2.bf16.msra.mxu0 %v2107_v18  ;;  %1860 = vmatpush2.bf16.msra.mxu1 %v2107_v18  ;;  %v98_v18 = vld [vmem:[#allocation2] sm:$0xff] }
  0x4e   :  { %707 = vmatmul.mubr.bf16.vlgmr.msra.gmra.mxu0 %v1882_v20  ;;  %835 = vmatmul.mubr.bf16.vlgmr.msra.gmra.mxu1 %v1885_v21 }
  0x4f   :  { %714 = vmatprep.mubr.bf16.mxu0 %v1888_v22  ;;  %842 = vmatprep.mubr.bf16.mxu1 %v1890_v23 }
  0x56   :  { %715 = vmatmul.mubr.bf16.gmra.mxu0 %v1892_v24  ;;  %843 = vmatmul.mubr.bf16.gmra.mxu1 %v1893_v25 }
  0x57   :  { %722 = vmatprep.mubr.bf16.mxu0 %v1894_v26  ;;  %850 = vmatprep.mubr.bf16.mxu1 %v1896_v27  ;;  %v99_v26 = vld [vmem:[#allocation2 + $0x8] sm:$0xff] }
  0x58   :  { %v131_v27 = vld [vmem:[#allocation2 + $0x108] sm:$0xff] }
  0x5e   :  { %723 = vmatmul.mubr.bf16.gmra.mxu0 %v1898_v28  ;;  %851 = vmatmul.mubr.bf16.gmra.mxu1 %v1899_v29 }
  0x5f   :  { %730 = vmatprep.mubr.bf16.mxu0 %v1900_v30  ;;  %858 = vmatprep.mubr.bf16.mxu1 %v1902_v31 }
  0x66   :  { %731 = vmatmul.mubr.bf16.gmra.mxu0 %v1904_v32  ;;  %859 = vmatmul.mubr.bf16.gmra.mxu1 %v1905_v33 }
  0x67   :  { %738 = vmatprep.mubr.bf16.mxu0 %v1906_v34  ;;  %866 = vmatprep.mubr.bf16.mxu1 %v1908_v35  ;;  %v100_v34 = vld [vmem:[#allocation2 + $0x10] sm:$0xff] }
  0x68   :  { %v132_v35 = vld [vmem:[#allocation2 + $0x110] sm:$0xff] }
  0x6e   :  { %739 = vmatmul.mubr.bf16.gmra.mxu0 %v1910_v36  ;;  %867 = vmatmul.mubr.bf16.gmra.mxu1 %v1911_v37  ;;  %v2248_v36 = vld [vmem:[%s2637_s2] ss:$0 sm:$0xff] }
  0x6f   :  { %746 = vmatprep.mubr.bf16.mxu0 %v1912_v38  ;;  %874 = vmatprep.mubr.bf16.mxu1 %v1914_v39 }
  0x76   :  { %747 = vmatmul.mubr.bf16.gmra.mxu0 %v1916_v40  ;;  %875 = vmatmul.mubr.bf16.gmra.mxu1 %v1917_v41  ;;  %v101_v41 = vld [vmem:[#allocation2 + $0x18] sm:$0xff] }
  0x77   :  { %754 = vmatprep.mubr.bf16.mxu0 %v1918_v42  ;;  %882 = vmatprep.mubr.bf16.mxu1 %v1920_v43 }
  0x7e   :  { %755 = vmatmul.mubr.bf16.gmra.mxu0 %v1922_v44  ;;  %883 = vmatmul.mubr.bf16.gmra.mxu1 %v1923_v45 }
  0x7f   :  { %762 = vmatprep.mubr.bf16.mxu0 %v1924_v46  ;;  %890 = vmatprep.mubr.bf16.mxu1 %v1926_v47  ;;  %v133_v46 = vld [vmem:[#allocation2 + $0x118] sm:$0xff] }
  0x86   :  { %763 = vmatmul.mubr.bf16.gmra.mxu0 %v1928_v48  ;;  %891 = vmatmul.mubr.bf16.gmra.mxu1 %v1929_v49 }
  0x87   :  { %770 = vmatprep.mubr.bf16.mxu0 %v1930_v50  ;;  %898 = vmatprep.mubr.bf16.mxu1 %v1932_v51 }
  0x8e   :  { %771 = vmatmul.mubr.bf16.gmra.mxu0 %v1934_v52  ;;  %899 = vmatmul.mubr.bf16.gmra.mxu1 %v1935_v53 }
  0x8f   :  { %778 = vmatprep.mubr.bf16.mxu0 %v1936_v54  ;;  %906 = vmatprep.mubr.bf16.mxu1 %v1938_v55  ;;  %v102_v55 = vld [vmem:[#allocation2 + $0x20] sm:$0xff] }
  0x96   :  { %779 = vmatmul.mubr.bf16.gmra.mxu0 %v1940_v56  ;;  %907 = vmatmul.mubr.bf16.gmra.mxu1 %v1941_v57 }
  0x97   :  { %786 = vmatprep.mubr.bf16.mxu0 %v1942_v58  ;;  %914 = vmatprep.mubr.bf16.mxu1 %v1944_v59 }
  0x9e   :  { %787 = vmatmul.mubr.bf16.gmra.mxu0 %v1946_v60  ;;  %915 = vmatmul.mubr.bf16.gmra.mxu1 %v1947_v61  ;;  %v134_v60 = vld [vmem:[#allocation2 + $0x120] sm:$0xff] }
  0x9f   :  { %794 = vmatprep.mubr.bf16.mxu0 %v1948_v62  ;;  %922 = vmatprep.mubr.bf16.mxu1 %v1950_v63 }
  0xa6   :  { %795 = vmatmul.mubr.bf16.gmra.mxu0 %v1952_v0  ;;  %923 = vmatmul.mubr.bf16.gmra.mxu1 %v1953_v1 }
  0xa7   :  { %802 = vmatprep.mubr.bf16.mxu0 %v1954_v2  ;;  %930 = vmatprep.mubr.bf16.mxu1 %v1956_v3 }
  0xae   :  { %803 = vmatmul.mubr.bf16.gmra.mxu0 %v1958_v4  ;;  %931 = vmatmul.mubr.bf16.gmra.mxu1 %v1959_v5 }
  0xaf   :  { %810 = vmatprep.mubr.bf16.mxu0 %v1960_v6  ;;  %938 = vmatprep.mubr.bf16.mxu1 %v1962_v7  ;;  %v103_v7 = vld [vmem:[#allocation2 + $0x28] sm:$0xff] }
  0xb6   :  { %811 = vmatmul.mubr.bf16.gmra.mxu0 %v1964_v8  ;;  %939 = vmatmul.mubr.bf16.gmra.mxu1 %v1965_v9 }
  0xb7   :  { %818 = vmatprep.mubr.bf16.mxu0 %v1966_v10  ;;  %946 = vmatprep.mubr.bf16.mxu1 %v1968_v11 }
  0xbe   :  { %819 = vmatmul.mubr.bf16.gmra.mxu0 %v1970_v12  ;;  %947 = vmatmul.mubr.bf16.gmra.mxu1 %v1971_v13  ;;  %v135_v12 = vld [vmem:[#allocation2 + $0x128] sm:$0xff] }
  0xbf   :  { %826 = vmatprep.mubr.bf16.mxu0 %v1972_v14  ;;  %954 = vmatprep.mubr.bf16.mxu1 %v1974_v15 }
  0xc6   :  { %827 = vmatmul.mubr.bf16.gmra.mxu0 %v1976_v16  ;;  %955 = vmatmul.mubr.bf16.gmra.mxu1 %v1977_v17 }
 0x10e   :  { %v708_v20 = vpop.f32.mrf.mxu0  ;;  %v836_v21 = vpop.f32.mrf.mxu1 }
 0x10f   :  { %v963_v22 = vadd.f32 %v708_v20, %v98_v18  ;;  %v995_v23 = vadd.f32 %v836_v21, %v130_v19 }
 0x110   :  { %v710_v24 = vpop.f32.mrf.mxu0  ;;  %v838_v25 = vpop.f32.mrf.mxu1 }
 0x111   :  { %1028 = vst.msk [vmem:[#allocation2] sm:$0xff] %vm33_vm0, %v963_v22  ;;  %1060 = vst.msk [vmem:[#allocation2 + $0x100] sm:$0xff] %vm33_vm0, %v995_v23  ;;  %v104_v23 = vld [vmem:[#allocation2 + $0x30] sm:$0xff] }
 0x112   :  { %v711_v28 = vpop.f32.mrf.mxu0  ;;  %v839_v29 = vpop.f32.mrf.mxu1 }
 0x113   :  { %v964_v30 = vadd.f32 %v711_v28, %v99_v26  ;;  %v996_v31 = vadd.f32 %v839_v29, %v131_v27  ;;  %v136_v28 = vld [vmem:[#allocation2 + $0x130] sm:$0xff] }
 0x114   :  { %v713_v32 = vpop.f32.mrf.mxu0  ;;  %v841_v33 = vpop.f32.mrf.mxu1 }
 0x115   :  { %1029 = vst.msk [vmem:[#allocation2 + $0x8] sm:$0xff] %vm33_vm0, %v964_v30  ;;  %1061 = vst.msk [vmem:[#allocation2 + $0x108] sm:$0xff] %vm33_vm0, %v996_v31 }
 0x116   :  { %v716_v37 = vpop.f32.mrf.mxu0  ;;  %v844_v38 = vpop.f32.mrf.mxu1 }
 0x117   :  { %v965_v39 = vadd.f32 %v716_v37, %v100_v34  ;;  %v997_v40 = vadd.f32 %v844_v38, %v132_v35 }
 0x118   :  { %v1095_v42 = vld [vmem:[#allocation2] sm:$0xff]  ;;  %v718_v44 = vpop.f32.mrf.mxu0  ;;  %v846_v45 = vpop.f32.mrf.mxu1 }
 0x119   :  { %v1127_v43 = vld [vmem:[#allocation2 + $0x100] sm:$0xff]  ;;  %v1166_v47 = vadd.f32 %v2248_v36, %v1095_v42  ;;  %1030 = vst.msk [vmem:[#allocation2 + $0x10] sm:$0xff] %vm33_vm0, %v965_v39  ;;  %1062 = vst.msk [vmem:[#allocation2 + $0x110] sm:$0xff] %vm33_vm0, %v997_v40  ;;  %v105_v40 = vld [vmem:[#allocation2 + $0x38] sm:$0xff] }
 0x11a   :  { %v1198_v48 = vadd.f32 %v2248_v36, %v1127_v43  ;;  %v719_v49 = vpop.f32.mrf.mxu0  ;;  %v847_v50 = vpop.f32.mrf.mxu1  ;;  %v137_v45 = vld [vmem:[#allocation2 + $0x138] sm:$0xff] }
 0x11b   :  { %v1230_v51 = vmax.f32 %v1166_v47, 0.0  ;;  %v966_v53 = vadd.f32 %v719_v49, %v101_v41  ;;  %v998_v54 = vadd.f32 %v847_v50, %v133_v46 }
 0x11c   :  { %v1262_v52 = vmax.f32 %v1198_v48, 0.0  ;;  %v1096_v56 = vld [vmem:[#allocation2 + $0x8] sm:$0xff]  ;;  %v721_v58 = vpop.f32.mrf.mxu0  ;;  %v849_v59 = vpop.f32.mrf.mxu1 }
 0x11d   :  { %v1128_v57 = vld [vmem:[#allocation2 + $0x108] sm:$0xff]  ;;  %v1765_v61 = vpack.c.bf16 %v1230_v51, %v1230_v51  ;;  %v1167_v63 = vadd.f32 %v2248_v36, %v1096_v56  ;;  %1031 = vst.msk [vmem:[#allocation2 + $0x18] sm:$0xff] %vm33_vm0, %v966_v53  ;;  %1063 = vst.msk [vmem:[#allocation2 + $0x118] sm:$0xff] %vm33_vm0, %v998_v54  ;;  %v106_v56 = vld [vmem:[#allocation2 + $0x40] sm:$0xff] }
 0x11e   :  { %v1797_v62 = vpack.c.bf16 %v1262_v52, %v1262_v52  ;;  %v1199_v0 = vadd.f32 %v2248_v36, %v1128_v57  ;;  %v724_v1 = vpop.f32.mrf.mxu0  ;;  %v852_v2 = vpop.f32.mrf.mxu1 }
 0x11f   :  { %1551 = vst.msk [vmem:[%s2638_s3] sm:$0xf] %vm1550_vm1, %v1765_v61  ;;  %v1231_v3 = vmax.f32 %v1167_v63, 0.0  ;;  %v967_v5 = vadd.f32 %v724_v1, %v102_v55  ;;  %v999_v6 = vadd.f32 %v852_v2, %v134_v60  ;;  %v138_v61 = vld [vmem:[#allocation2 + $0x140] sm:$0xff] }
 0x120   :  { %1583 = vst.msk [vmem:[%s2638_s3 + $0x80] sm:$0xf] %vm1550_vm1, %v1797_v62  ;;  %v1263_v4 = vmax.f32 %v1199_v0, 0.0  ;;  %v1097_v8 = vld [vmem:[#allocation2 + $0x10] sm:$0xff]  ;;  %v726_v10 = vpop.f32.mrf.mxu0  ;;  %v854_v11 = vpop.f32.mrf.mxu1 }
 0x121   :  { %v1129_v9 = vld [vmem:[#allocation2 + $0x110] sm:$0xff]  ;;  %v1766_v13 = vpack.c.bf16 %v1231_v3, %v1231_v3  ;;  %v1168_v15 = vadd.f32 %v2248_v36, %v1097_v8  ;;  %1032 = vst.msk [vmem:[#allocation2 + $0x20] sm:$0xff] %vm33_vm0, %v967_v5  ;;  %1064 = vst.msk [vmem:[#allocation2 + $0x120] sm:$0xff] %vm33_vm0, %v999_v6  ;;  %v107_v8 = vld [vmem:[#allocation2 + $0x48] sm:$0xff] }
 0x122   :  { %v1798_v14 = vpack.c.bf16 %v1263_v4, %v1263_v4  ;;  %v1200_v16 = vadd.f32 %v2248_v36, %v1129_v9  ;;  %v727_v17 = vpop.f32.mrf.mxu0  ;;  %v855_v18 = vpop.f32.mrf.mxu1 }
 0x123   :  { %1552 = vst.msk [vmem:[%s2638_s3 + $0x4] sm:$0xf] %vm1550_vm1, %v1766_v13  ;;  %v1232_v19 = vmax.f32 %v1168_v15, 0.0  ;;  %v968_v21 = vadd.f32 %v727_v17, %v103_v7  ;;  %v1000_v22 = vadd.f32 %v855_v18, %v135_v12  ;;  %v139_v13 = vld [vmem:[#allocation2 + $0x148] sm:$0xff] }
 0x124   :  { %1584 = vst.msk [vmem:[%s2638_s3 + $0x84] sm:$0xf] %vm1550_vm1, %v1798_v14  ;;  %v1264_v20 = vmax.f32 %v1200_v16, 0.0  ;;  %v1098_v24 = vld [vmem:[#allocation2 + $0x18] sm:$0xff]  ;;  %v729_v26 = vpop.f32.mrf.mxu0  ;;  %v857_v27 = vpop.f32.mrf.mxu1 }
 0x125   :  { %v1130_v25 = vld [vmem:[#allocation2 + $0x118] sm:$0xff]  ;;  %v1767_v29 = vpack.c.bf16 %v1232_v19, %v1232_v19  ;;  %v1169_v31 = vadd.f32 %v2248_v36, %v1098_v24  ;;  %1033 = vst.msk [vmem:[#allocation2 + $0x28] sm:$0xff] %vm33_vm0, %v968_v21  ;;  %1065 = vst.msk [vmem:[#allocation2 + $0x128] sm:$0xff] %vm33_vm0, %v1000_v22  ;;  %v108_v24 = vld [vmem:[#allocation2 + $0x50] sm:$0xff] }
 0x126   :  { %v1799_v30 = vpack.c.bf16 %v1264_v20, %v1264_v20  ;;  %v1201_v32 = vadd.f32 %v2248_v36, %v1130_v25  ;;  %v732_v33 = vpop.f32.mrf.mxu0  ;;  %v860_v34 = vpop.f32.mrf.mxu1 }
 0x127   :  { %1553 = vst.msk [vmem:[%s2638_s3 + $0x8] sm:$0xf] %vm1550_vm1, %v1767_v29  ;;  %v1233_v35 = vmax.f32 %v1169_v31, 0.0  ;;  %v969_v38 = vadd.f32 %v732_v33, %v104_v23  ;;  %v1001_v39 = vadd.f32 %v860_v34, %v136_v28  ;;  %v140_v29 = vld [vmem:[#allocation2 + $0x150] sm:$0xff] }
 0x128   :  { %1585 = vst.msk [vmem:[%s2638_s3 + $0x88] sm:$0xf] %vm1550_vm1, %v1799_v30  ;;  %v1265_v37 = vmax.f32 %v1201_v32, 0.0  ;;  %v1099_v41 = vld [vmem:[#allocation2 + $0x20] sm:$0xff]  ;;  %v734_v43 = vpop.f32.mrf.mxu0  ;;  %v862_v44 = vpop.f32.mrf.mxu1 }
 0x129   :  { %v1131_v42 = vld [vmem:[#allocation2 + $0x120] sm:$0xff]  ;;  %v1768_v46 = vpack.c.bf16 %v1233_v35, %v1233_v35  ;;  %v1170_v48 = vadd.f32 %v2248_v36, %v1099_v41  ;;  %1034 = vst.msk [vmem:[#allocation2 + $0x30] sm:$0xff] %vm33_vm0, %v969_v38  ;;  %1066 = vst.msk [vmem:[#allocation2 + $0x130] sm:$0xff] %vm33_vm0, %v1001_v39  ;;  %v109_v41 = vld [vmem:[#allocation2 + $0x58] sm:$0xff] }
 0x12a   :  { %v1800_v47 = vpack.c.bf16 %v1265_v37, %v1265_v37  ;;  %v1202_v49 = vadd.f32 %v2248_v36, %v1131_v42  ;;  %v735_v50 = vpop.f32.mrf.mxu0  ;;  %v863_v51 = vpop.f32.mrf.mxu1 }
 0x12b   :  { %1554 = vst.msk [vmem:[%s2638_s3 + $0xc] sm:$0xf] %vm1550_vm1, %v1768_v46  ;;  %v1234_v52 = vmax.f32 %v1170_v48, 0.0  ;;  %v970_v54 = vadd.f32 %v735_v50, %v105_v40  ;;  %v1002_v55 = vadd.f32 %v863_v51, %v137_v45  ;;  %v141_v46 = vld [vmem:[#allocation2 + $0x158] sm:$0xff] }
 0x12c   :  { %1586 = vst.msk [vmem:[%s2638_s3 + $0x8c] sm:$0xf] %vm1550_vm1, %v1800_v47  ;;  %v1266_v53 = vmax.f32 %v1202_v49, 0.0  ;;  %v1100_v57 = vld [vmem:[#allocation2 + $0x28] sm:$0xff]  ;;  %v737_v59 = vpop.f32.mrf.mxu0  ;;  %v865_v60 = vpop.f32.mrf.mxu1 }
 0x12d   :  { %v1132_v58 = vld [vmem:[#allocation2 + $0x128] sm:$0xff]  ;;  %v1769_v62 = vpack.c.bf16 %v1234_v52, %v1234_v52  ;;  %v1171_v0 = vadd.f32 %v2248_v36, %v1100_v57  ;;  %1035 = vst.msk [vmem:[#allocation2 + $0x38] sm:$0xff] %vm33_vm0, %v970_v54  ;;  %1067 = vst.msk [vmem:[#allocation2 + $0x138] sm:$0xff] %vm33_vm0, %v1002_v55  ;;  %v110_v57 = vld [vmem:[#allocation2 + $0x60] sm:$0xff] }
 0x12e   :  { %v1801_v63 = vpack.c.bf16 %v1266_v53, %v1266_v53  ;;  %v1203_v1 = vadd.f32 %v2248_v36, %v1132_v58  ;;  %v740_v2 = vpop.f32.mrf.mxu0  ;;  %v868_v3 = vpop.f32.mrf.mxu1 }
 0x12f   :  { %1555 = vst.msk [vmem:[%s2638_s3 + $0x10] sm:$0xf] %vm1550_vm1, %v1769_v62  ;;  %v1235_v4 = vmax.f32 %v1171_v0, 0.0  ;;  %v971_v6 = vadd.f32 %v740_v2, %v106_v56  ;;  %v1003_v7 = vadd.f32 %v868_v3, %v138_v61  ;;  %v142_v62 = vld [vmem:[#allocation2 + $0x160] sm:$0xff] }
 0x130   :  { %1587 = vst.msk [vmem:[%s2638_s3 + $0x90] sm:$0xf] %vm1550_vm1, %v1801_v63  ;;  %v1267_v5 = vmax.f32 %v1203_v1, 0.0  ;;  %v1101_v9 = vld [vmem:[#allocation2 + $0x30] sm:$0xff]  ;;  %v742_v11 = vpop.f32.mrf.mxu0  ;;  %v870_v12 = vpop.f32.mrf.mxu1 }
 0x131   :  { %v1133_v10 = vld [vmem:[#allocation2 + $0x130] sm:$0xff]  ;;  %v1770_v14 = vpack.c.bf16 %v1235_v4, %v1235_v4  ;;  %v1172_v16 = vadd.f32 %v2248_v36, %v1101_v9  ;;  %1036 = vst.msk [vmem:[#allocation2 + $0x40] sm:$0xff] %vm33_vm0, %v971_v6  ;;  %1068 = vst.msk [vmem:[#allocation2 + $0x140] sm:$0xff] %vm33_vm0, %v1003_v7  ;;  %v111_v9 = vld [vmem:[#allocation2 + $0x68] sm:$0xff] }
 0x132   :  { %v1802_v15 = vpack.c.bf16 %v1267_v5, %v1267_v5  ;;  %v1204_v17 = vadd.f32 %v2248_v36, %v1133_v10  ;;  %v743_v18 = vpop.f32.mrf.mxu0  ;;  %v871_v19 = vpop.f32.mrf.mxu1 }
 0x133   :  { %1556 = vst.msk [vmem:[%s2638_s3 + $0x14] sm:$0xf] %vm1550_vm1, %v1770_v14  ;;  %v1236_v20 = vmax.f32 %v1172_v16, 0.0  ;;  %v972_v22 = vadd.f32 %v743_v18, %v107_v8  ;;  %v1004_v23 = vadd.f32 %v871_v19, %v139_v13  ;;  %v143_v14 = vld [vmem:[#allocation2 + $0x168] sm:$0xff] }
 0x134   :  { %1588 = vst.msk [vmem:[%s2638_s3 + $0x94] sm:$0xf] %vm1550_vm1, %v1802_v15  ;;  %v1268_v21 = vmax.f32 %v1204_v17, 0.0  ;;  %v1102_v25 = vld [vmem:[#allocation2 + $0x38] sm:$0xff]  ;;  %v745_v27 = vpop.f32.mrf.mxu0  ;;  %v873_v28 = vpop.f32.mrf.mxu1 }
 0x135   :  { %v1134_v26 = vld [vmem:[#allocation2 + $0x138] sm:$0xff]  ;;  %v1771_v30 = vpack.c.bf16 %v1236_v20, %v1236_v20  ;;  %v1173_v32 = vadd.f32 %v2248_v36, %v1102_v25  ;;  %1037 = vst.msk [vmem:[#allocation2 + $0x48] sm:$0xff] %vm33_vm0, %v972_v22  ;;  %1069 = vst.msk [vmem:[#allocation2 + $0x148] sm:$0xff] %vm33_vm0, %v1004_v23  ;;  %v112_v25 = vld [vmem:[#allocation2 + $0x70] sm:$0xff] }
 0x136   :  { %v1803_v31 = vpack.c.bf16 %v1268_v21, %v1268_v21  ;;  %v1205_v33 = vadd.f32 %v2248_v36, %v1134_v26  ;;  %v748_v34 = vpop.f32.mrf.mxu0  ;;  %v876_v35 = vpop.f32.mrf.mxu1 }
 0x137   :  { %1557 = vst.msk [vmem:[%s2638_s3 + $0x18] sm:$0xf] %vm1550_vm1, %v1771_v30  ;;  %v1237_v37 = vmax.f32 %v1173_v32, 0.0  ;;  %v973_v39 = vadd.f32 %v748_v34, %v108_v24  ;;  %v1005_v40 = vadd.f32 %v876_v35, %v140_v29  ;;  %v144_v30 = vld [vmem:[#allocation2 + $0x170] sm:$0xff] }
 0x138   :  { %1589 = vst.msk [vmem:[%s2638_s3 + $0x98] sm:$0xf] %vm1550_vm1, %v1803_v31  ;;  %v1269_v38 = vmax.f32 %v1205_v33, 0.0  ;;  %v1103_v42 = vld [vmem:[#allocation2 + $0x40] sm:$0xff]  ;;  %v750_v44 = vpop.f32.mrf.mxu0  ;;  %v878_v45 = vpop.f32.mrf.mxu1 }
 0x139   :  { %v1135_v43 = vld [vmem:[#allocation2 + $0x140] sm:$0xff]  ;;  %v1772_v47 = vpack.c.bf16 %v1237_v37, %v1237_v37  ;;  %v1174_v49 = vadd.f32 %v2248_v36, %v1103_v42  ;;  %1038 = vst.msk [vmem:[#allocation2 + $0x50] sm:$0xff] %vm33_vm0, %v973_v39  ;;  %1070 = vst.msk [vmem:[#allocation2 + $0x150] sm:$0xff] %vm33_vm0, %v1005_v40  ;;  %v113_v42 = vld [vmem:[#allocation2 + $0x78] sm:$0xff] }
 0x13a   :  { %v1804_v48 = vpack.c.bf16 %v1269_v38, %v1269_v38  ;;  %v1206_v50 = vadd.f32 %v2248_v36, %v1135_v43  ;;  %v751_v51 = vpop.f32.mrf.mxu0  ;;  %v879_v52 = vpop.f32.mrf.mxu1 }
 0x13b   :  { %1558 = vst.msk [vmem:[%s2638_s3 + $0x1c] sm:$0xf] %vm1550_vm1, %v1772_v47  ;;  %v1238_v53 = vmax.f32 %v1174_v49, 0.0  ;;  %v974_v55 = vadd.f32 %v751_v51, %v109_v41  ;;  %v1006_v56 = vadd.f32 %v879_v52, %v141_v46  ;;  %v145_v47 = vld [vmem:[#allocation2 + $0x178] sm:$0xff] }
 0x13c   :  { %1590 = vst.msk [vmem:[%s2638_s3 + $0x9c] sm:$0xf] %vm1550_vm1, %v1804_v48  ;;  %v1270_v54 = vmax.f32 %v1206_v50, 0.0  ;;  %v1104_v58 = vld [vmem:[#allocation2 + $0x48] sm:$0xff]  ;;  %v753_v60 = vpop.f32.mrf.mxu0  ;;  %v881_v61 = vpop.f32.mrf.mxu1 }
 0x13d   :  { %v1136_v59 = vld [vmem:[#allocation2 + $0x148] sm:$0xff]  ;;  %v1773_v63 = vpack.c.bf16 %v1238_v53, %v1238_v53  ;;  %v1175_v1 = vadd.f32 %v2248_v36, %v1104_v58  ;;  %1039 = vst.msk [vmem:[#allocation2 + $0x58] sm:$0xff] %vm33_vm0, %v974_v55  ;;  %1071 = vst.msk [vmem:[#allocation2 + $0x158] sm:$0xff] %vm33_vm0, %v1006_v56  ;;  %v114_v58 = vld [vmem:[#allocation2 + $0x80] sm:$0xff] }
 0x13e   :  { %v1805_v0 = vpack.c.bf16 %v1270_v54, %v1270_v54  ;;  %v1207_v2 = vadd.f32 %v2248_v36, %v1136_v59  ;;  %v756_v3 = vpop.f32.mrf.mxu0  ;;  %v884_v4 = vpop.f32.mrf.mxu1 }
 0x13f   :  { %1559 = vst.msk [vmem:[%s2638_s3 + $0x20] sm:$0xf] %vm1550_vm1, %v1773_v63  ;;  %v1239_v5 = vmax.f32 %v1175_v1, 0.0  ;;  %v975_v7 = vadd.f32 %v756_v3, %v110_v57  ;;  %v1007_v8 = vadd.f32 %v884_v4, %v142_v62  ;;  %v146_v63 = vld [vmem:[#allocation2 + $0x180] sm:$0xff] }
 0x140   :  { %1591 = vst.msk [vmem:[%s2638_s3 + $0xa0] sm:$0xf] %vm1550_vm1, %v1805_v0  ;;  %v1271_v6 = vmax.f32 %v1207_v2, 0.0  ;;  %v1105_v10 = vld [vmem:[#allocation2 + $0x50] sm:$0xff]  ;;  %v758_v12 = vpop.f32.mrf.mxu0  ;;  %v886_v13 = vpop.f32.mrf.mxu1 }
 0x141   :  { %v1137_v11 = vld [vmem:[#allocation2 + $0x150] sm:$0xff]  ;;  %v1774_v15 = vpack.c.bf16 %v1239_v5, %v1239_v5  ;;  %v1176_v17 = vadd.f32 %v2248_v36, %v1105_v10  ;;  %1040 = vst.msk [vmem:[#allocation2 + $0x60] sm:$0xff] %vm33_vm0, %v975_v7  ;;  %1072 = vst.msk [vmem:[#allocation2 + $0x160] sm:$0xff] %vm33_vm0, %v1007_v8  ;;  %v115_v10 = vld [vmem:[#allocation2 + $0x88] sm:$0xff] }
 0x142   :  { %v1806_v16 = vpack.c.bf16 %v1271_v6, %v1271_v6  ;;  %v1208_v18 = vadd.f32 %v2248_v36, %v1137_v11  ;;  %v759_v19 = vpop.f32.mrf.mxu0  ;;  %v887_v20 = vpop.f32.mrf.mxu1 }
 0x143   :  { %1560 = vst.msk [vmem:[%s2638_s3 + $0x24] sm:$0xf] %vm1550_vm1, %v1774_v15  ;;  %v1240_v21 = vmax.f32 %v1176_v17, 0.0  ;;  %v976_v23 = vadd.f32 %v759_v19, %v111_v9  ;;  %v1008_v24 = vadd.f32 %v887_v20, %v143_v14  ;;  %v147_v15 = vld [vmem:[#allocation2 + $0x188] sm:$0xff] }
 0x144   :  { %1592 = vst.msk [vmem:[%s2638_s3 + $0xa4] sm:$0xf] %vm1550_vm1, %v1806_v16  ;;  %v1272_v22 = vmax.f32 %v1208_v18, 0.0  ;;  %v1106_v26 = vld [vmem:[#allocation2 + $0x58] sm:$0xff]  ;;  %v761_v28 = vpop.f32.mrf.mxu0  ;;  %v889_v29 = vpop.f32.mrf.mxu1 }
 0x145   :  { %v1138_v27 = vld [vmem:[#allocation2 + $0x158] sm:$0xff]  ;;  %v1775_v31 = vpack.c.bf16 %v1240_v21, %v1240_v21  ;;  %v1177_v33 = vadd.f32 %v2248_v36, %v1106_v26  ;;  %1041 = vst.msk [vmem:[#allocation2 + $0x68] sm:$0xff] %vm33_vm0, %v976_v23  ;;  %1073 = vst.msk [vmem:[#allocation2 + $0x168] sm:$0xff] %vm33_vm0, %v1008_v24  ;;  %v116_v26 = vld [vmem:[#allocation2 + $0x90] sm:$0xff] }
 0x146   :  { %v1807_v32 = vpack.c.bf16 %v1272_v22, %v1272_v22  ;;  %v1209_v34 = vadd.f32 %v2248_v36, %v1138_v27  ;;  %v764_v35 = vpop.f32.mrf.mxu0  ;;  %v892_v37 = vpop.f32.mrf.mxu1 }
 0x147   :  { %1561 = vst.msk [vmem:[%s2638_s3 + $0x28] sm:$0xf] %vm1550_vm1, %v1775_v31  ;;  %v1241_v38 = vmax.f32 %v1177_v33, 0.0  ;;  %v977_v40 = vadd.f32 %v764_v35, %v112_v25  ;;  %v1009_v41 = vadd.f32 %v892_v37, %v144_v30  ;;  %v148_v31 = vld [vmem:[#allocation2 + $0x190] sm:$0xff] }
 0x148   :  { %1593 = vst.msk [vmem:[%s2638_s3 + $0xa8] sm:$0xf] %vm1550_vm1, %v1807_v32  ;;  %v1273_v39 = vmax.f32 %v1209_v34, 0.0  ;;  %v1107_v43 = vld [vmem:[#allocation2 + $0x60] sm:$0xff]  ;;  %v766_v45 = vpop.f32.mrf.mxu0  ;;  %v894_v46 = vpop.f32.mrf.mxu1 }
 0x149   :  { %v1139_v44 = vld [vmem:[#allocation2 + $0x160] sm:$0xff]  ;;  %v1776_v48 = vpack.c.bf16 %v1241_v38, %v1241_v38  ;;  %v1178_v50 = vadd.f32 %v2248_v36, %v1107_v43  ;;  %1042 = vst.msk [vmem:[#allocation2 + $0x70] sm:$0xff] %vm33_vm0, %v977_v40  ;;  %1074 = vst.msk [vmem:[#allocation2 + $0x170] sm:$0xff] %vm33_vm0, %v1009_v41  ;;  %v117_v43 = vld [vmem:[#allocation2 + $0x98] sm:$0xff] }
 0x14a   :  { %v1808_v49 = vpack.c.bf16 %v1273_v39, %v1273_v39  ;;  %v1210_v51 = vadd.f32 %v2248_v36, %v1139_v44  ;;  %v767_v52 = vpop.f32.mrf.mxu0  ;;  %v895_v53 = vpop.f32.mrf.mxu1 }
 0x14b   :  { %1562 = vst.msk [vmem:[%s2638_s3 + $0x2c] sm:$0xf] %vm1550_vm1, %v1776_v48  ;;  %v1242_v54 = vmax.f32 %v1178_v50, 0.0  ;;  %v978_v56 = vadd.f32 %v767_v52, %v113_v42  ;;  %v1010_v57 = vadd.f32 %v895_v53, %v145_v47  ;;  %v149_v48 = vld [vmem:[#allocation2 + $0x198] sm:$0xff] }
 0x14c   :  { %1594 = vst.msk [vmem:[%s2638_s3 + $0xac] sm:$0xf] %vm1550_vm1, %v1808_v49  ;;  %v1274_v55 = vmax.f32 %v1210_v51, 0.0  ;;  %v1108_v59 = vld [vmem:[#allocation2 + $0x68] sm:$0xff]  ;;  %v769_v61 = vpop.f32.mrf.mxu0  ;;  %v897_v62 = vpop.f32.mrf.mxu1 }
 0x14d   :  { %v1140_v60 = vld [vmem:[#allocation2 + $0x168] sm:$0xff]  ;;  %v1777_v0 = vpack.c.bf16 %v1242_v54, %v1242_v54  ;;  %v1179_v2 = vadd.f32 %v2248_v36, %v1108_v59  ;;  %1043 = vst.msk [vmem:[#allocation2 + $0x78] sm:$0xff] %vm33_vm0, %v978_v56  ;;  %1075 = vst.msk [vmem:[#allocation2 + $0x178] sm:$0xff] %vm33_vm0, %v1010_v57  ;;  %v118_v59 = vld [vmem:[#allocation2 + $0xa0] sm:$0xff] }
 0x14e   :  { %v1809_v1 = vpack.c.bf16 %v1274_v55, %v1274_v55  ;;  %v1211_v3 = vadd.f32 %v2248_v36, %v1140_v60  ;;  %v772_v4 = vpop.f32.mrf.mxu0  ;;  %v900_v5 = vpop.f32.mrf.mxu1 }
 0x14f   :  { %1563 = vst.msk [vmem:[%s2638_s3 + $0x30] sm:$0xf] %vm1550_vm1, %v1777_v0  ;;  %v1243_v6 = vmax.f32 %v1179_v2, 0.0  ;;  %v979_v8 = vadd.f32 %v772_v4, %v114_v58  ;;  %v1011_v9 = vadd.f32 %v900_v5, %v146_v63  ;;  %v150_v0 = vld [vmem:[#allocation2 + $0x1a0] sm:$0xff] }
 0x150   :  { %1595 = vst.msk [vmem:[%s2638_s3 + $0xb0] sm:$0xf] %vm1550_vm1, %v1809_v1  ;;  %v1275_v7 = vmax.f32 %v1211_v3, 0.0  ;;  %v1109_v11 = vld [vmem:[#allocation2 + $0x70] sm:$0xff]  ;;  %v774_v13 = vpop.f32.mrf.mxu0  ;;  %v902_v14 = vpop.f32.mrf.mxu1 }
 0x151   :  { %v1141_v12 = vld [vmem:[#allocation2 + $0x170] sm:$0xff]  ;;  %v1778_v16 = vpack.c.bf16 %v1243_v6, %v1243_v6  ;;  %v1180_v18 = vadd.f32 %v2248_v36, %v1109_v11  ;;  %1044 = vst.msk [vmem:[#allocation2 + $0x80] sm:$0xff] %vm33_vm0, %v979_v8  ;;  %1076 = vst.msk [vmem:[#allocation2 + $0x180] sm:$0xff] %vm33_vm0, %v1011_v9  ;;  %v119_v11 = vld [vmem:[#allocation2 + $0xa8] sm:$0xff] }
 0x152   :  { %v1810_v17 = vpack.c.bf16 %v1275_v7, %v1275_v7  ;;  %v1212_v19 = vadd.f32 %v2248_v36, %v1141_v12  ;;  %v775_v20 = vpop.f32.mrf.mxu0  ;;  %v903_v21 = vpop.f32.mrf.mxu1 }
 0x153   :  { %1564 = vst.msk [vmem:[%s2638_s3 + $0x34] sm:$0xf] %vm1550_vm1, %v1778_v16  ;;  %v1244_v22 = vmax.f32 %v1180_v18, 0.0  ;;  %v980_v24 = vadd.f32 %v775_v20, %v115_v10  ;;  %v1012_v25 = vadd.f32 %v903_v21, %v147_v15  ;;  %v151_v16 = vld [vmem:[#allocation2 + $0x1a8] sm:$0xff] }
 0x154   :  { %1596 = vst.msk [vmem:[%s2638_s3 + $0xb4] sm:$0xf] %vm1550_vm1, %v1810_v17  ;;  %v1276_v23 = vmax.f32 %v1212_v19, 0.0  ;;  %v1110_v27 = vld [vmem:[#allocation2 + $0x78] sm:$0xff]  ;;  %v777_v29 = vpop.f32.mrf.mxu0  ;;  %v905_v30 = vpop.f32.mrf.mxu1 }
 0x155   :  { %v1142_v28 = vld [vmem:[#allocation2 + $0x178] sm:$0xff]  ;;  %v1779_v32 = vpack.c.bf16 %v1244_v22, %v1244_v22  ;;  %v1181_v34 = vadd.f32 %v2248_v36, %v1110_v27  ;;  %1045 = vst.msk [vmem:[#allocation2 + $0x88] sm:$0xff] %vm33_vm0, %v980_v24  ;;  %1077 = vst.msk [vmem:[#allocation2 + $0x188] sm:$0xff] %vm33_vm0, %v1012_v25  ;;  %v120_v27 = vld [vmem:[#allocation2 + $0xb0] sm:$0xff] }
 0x156   :  { %v1811_v33 = vpack.c.bf16 %v1276_v23, %v1276_v23  ;;  %v1213_v35 = vadd.f32 %v2248_v36, %v1142_v28  ;;  %v780_v37 = vpop.f32.mrf.mxu0  ;;  %v908_v38 = vpop.f32.mrf.mxu1 }
 0x157   :  { %1565 = vst.msk [vmem:[%s2638_s3 + $0x38] sm:$0xf] %vm1550_vm1, %v1779_v32  ;;  %v1245_v39 = vmax.f32 %v1181_v34, 0.0  ;;  %v981_v41 = vadd.f32 %v780_v37, %v116_v26  ;;  %v1013_v42 = vadd.f32 %v908_v38, %v148_v31  ;;  %v152_v32 = vld [vmem:[#allocation2 + $0x1b0] sm:$0xff] }
 0x158   :  { %1597 = vst.msk [vmem:[%s2638_s3 + $0xb8] sm:$0xf] %vm1550_vm1, %v1811_v33  ;;  %v1277_v40 = vmax.f32 %v1213_v35, 0.0  ;;  %v1111_v44 = vld [vmem:[#allocation2 + $0x80] sm:$0xff]  ;;  %v782_v46 = vpop.f32.mrf.mxu0  ;;  %v910_v47 = vpop.f32.mrf.mxu1 }
 0x159   :  { %v1143_v45 = vld [vmem:[#allocation2 + $0x180] sm:$0xff]  ;;  %v1780_v49 = vpack.c.bf16 %v1245_v39, %v1245_v39  ;;  %v1182_v51 = vadd.f32 %v2248_v36, %v1111_v44  ;;  %1046 = vst.msk [vmem:[#allocation2 + $0x90] sm:$0xff] %vm33_vm0, %v981_v41  ;;  %1078 = vst.msk [vmem:[#allocation2 + $0x190] sm:$0xff] %vm33_vm0, %v1013_v42  ;;  %v121_v44 = vld [vmem:[#allocation2 + $0xb8] sm:$0xff] }
 0x15a   :  { %v1812_v50 = vpack.c.bf16 %v1277_v40, %v1277_v40  ;;  %v1214_v52 = vadd.f32 %v2248_v36, %v1143_v45  ;;  %v783_v53 = vpop.f32.mrf.mxu0  ;;  %v911_v54 = vpop.f32.mrf.mxu1 }
 0x15b   :  { %1566 = vst.msk [vmem:[%s2638_s3 + $0x3c] sm:$0xf] %vm1550_vm1, %v1780_v49  ;;  %v1246_v55 = vmax.f32 %v1182_v51, 0.0  ;;  %v982_v57 = vadd.f32 %v783_v53, %v117_v43  ;;  %v1014_v58 = vadd.f32 %v911_v54, %v149_v48  ;;  %v153_v49 = vld [vmem:[#allocation2 + $0x1b8] sm:$0xff] }
 0x15c   :  { %1598 = vst.msk [vmem:[%s2638_s3 + $0xbc] sm:$0xf] %vm1550_vm1, %v1812_v50  ;;  %v1278_v56 = vmax.f32 %v1214_v52, 0.0  ;;  %v1112_v60 = vld [vmem:[#allocation2 + $0x88] sm:$0xff]  ;;  %v785_v62 = vpop.f32.mrf.mxu0  ;;  %v913_v63 = vpop.f32.mrf.mxu1 }
 0x15d   :  { %v1144_v61 = vld [vmem:[#allocation2 + $0x188] sm:$0xff]  ;;  %v1781_v1 = vpack.c.bf16 %v1246_v55, %v1246_v55  ;;  %v1183_v3 = vadd.f32 %v2248_v36, %v1112_v60  ;;  %1047 = vst.msk [vmem:[#allocation2 + $0x98] sm:$0xff] %vm33_vm0, %v982_v57  ;;  %1079 = vst.msk [vmem:[#allocation2 + $0x198] sm:$0xff] %vm33_vm0, %v1014_v58  ;;  %v122_v60 = vld [vmem:[#allocation2 + $0xc0] sm:$0xff] }
 0x15e   :  { %v1813_v2 = vpack.c.bf16 %v1278_v56, %v1278_v56  ;;  %v1215_v4 = vadd.f32 %v2248_v36, %v1144_v61  ;;  %v788_v5 = vpop.f32.mrf.mxu0  ;;  %v916_v6 = vpop.f32.mrf.mxu1 }
 0x15f   :  { %1567 = vst.msk [vmem:[%s2638_s3 + $0x40] sm:$0xf] %vm1550_vm1, %v1781_v1  ;;  %v1247_v7 = vmax.f32 %v1183_v3, 0.0  ;;  %v983_v9 = vadd.f32 %v788_v5, %v118_v59  ;;  %v1015_v10 = vadd.f32 %v916_v6, %v150_v0  ;;  %v154_v1 = vld [vmem:[#allocation2 + $0x1c0] sm:$0xff] }
 0x160   :  { %1599 = vst.msk [vmem:[%s2638_s3 + $0xc0] sm:$0xf] %vm1550_vm1, %v1813_v2  ;;  %v1279_v8 = vmax.f32 %v1215_v4, 0.0  ;;  %v1113_v12 = vld [vmem:[#allocation2 + $0x90] sm:$0xff]  ;;  %v790_v14 = vpop.f32.mrf.mxu0  ;;  %v918_v15 = vpop.f32.mrf.mxu1 }
 0x161   :  { %v1145_v13 = vld [vmem:[#allocation2 + $0x190] sm:$0xff]  ;;  %v1782_v17 = vpack.c.bf16 %v1247_v7, %v1247_v7  ;;  %v1184_v19 = vadd.f32 %v2248_v36, %v1113_v12  ;;  %1048 = vst.msk [vmem:[#allocation2 + $0xa0] sm:$0xff] %vm33_vm0, %v983_v9  ;;  %1080 = vst.msk [vmem:[#allocation2 + $0x1a0] sm:$0xff] %vm33_vm0, %v1015_v10  ;;  %v123_v12 = vld [vmem:[#allocation2 + $0xc8] sm:$0xff] }
 0x162   :  { %v1814_v18 = vpack.c.bf16 %v1279_v8, %v1279_v8  ;;  %v1216_v20 = vadd.f32 %v2248_v36, %v1145_v13  ;;  %v791_v21 = vpop.f32.mrf.mxu0  ;;  %v919_v22 = vpop.f32.mrf.mxu1 }
 0x163   :  { %1568 = vst.msk [vmem:[%s2638_s3 + $0x44] sm:$0xf] %vm1550_vm1, %v1782_v17  ;;  %v1248_v23 = vmax.f32 %v1184_v19, 0.0  ;;  %v984_v25 = vadd.f32 %v791_v21, %v119_v11  ;;  %v1016_v26 = vadd.f32 %v919_v22, %v151_v16  ;;  %v155_v17 = vld [vmem:[#allocation2 + $0x1c8] sm:$0xff] }
 0x164   :  { %1600 = vst.msk [vmem:[%s2638_s3 + $0xc4] sm:$0xf] %vm1550_vm1, %v1814_v18  ;;  %v1280_v24 = vmax.f32 %v1216_v20, 0.0  ;;  %v1114_v28 = vld [vmem:[#allocation2 + $0x98] sm:$0xff]  ;;  %v793_v30 = vpop.f32.mrf.mxu0  ;;  %v921_v31 = vpop.f32.mrf.mxu1 }
 0x165   :  { %v1146_v29 = vld [vmem:[#allocation2 + $0x198] sm:$0xff]  ;;  %v1783_v33 = vpack.c.bf16 %v1248_v23, %v1248_v23  ;;  %v1185_v35 = vadd.f32 %v2248_v36, %v1114_v28  ;;  %1049 = vst.msk [vmem:[#allocation2 + $0xa8] sm:$0xff] %vm33_vm0, %v984_v25  ;;  %1081 = vst.msk [vmem:[#allocation2 + $0x1a8] sm:$0xff] %vm33_vm0, %v1016_v26  ;;  %v124_v28 = vld [vmem:[#allocation2 + $0xd0] sm:$0xff] }
 0x166   :  { %v1815_v34 = vpack.c.bf16 %v1280_v24, %v1280_v24  ;;  %v1217_v37 = vadd.f32 %v2248_v36, %v1146_v29  ;;  %v796_v38 = vpop.f32.mrf.mxu0  ;;  %v924_v39 = vpop.f32.mrf.mxu1 }
 0x167   :  { %1569 = vst.msk [vmem:[%s2638_s3 + $0x48] sm:$0xf] %vm1550_vm1, %v1783_v33  ;;  %v1249_v40 = vmax.f32 %v1185_v35, 0.0  ;;  %v985_v42 = vadd.f32 %v796_v38, %v120_v27  ;;  %v1017_v43 = vadd.f32 %v924_v39, %v152_v32  ;;  %v156_v33 = vld [vmem:[#allocation2 + $0x1d0] sm:$0xff] }
 0x168   :  { %1601 = vst.msk [vmem:[%s2638_s3 + $0xc8] sm:$0xf] %vm1550_vm1, %v1815_v34  ;;  %v1281_v41 = vmax.f32 %v1217_v37, 0.0  ;;  %v1115_v45 = vld [vmem:[#allocation2 + $0xa0] sm:$0xff]  ;;  %v798_v47 = vpop.f32.mrf.mxu0  ;;  %v926_v48 = vpop.f32.mrf.mxu1 }
 0x169   :  { %v1147_v46 = vld [vmem:[#allocation2 + $0x1a0] sm:$0xff]  ;;  %v1784_v50 = vpack.c.bf16 %v1249_v40, %v1249_v40  ;;  %v1186_v52 = vadd.f32 %v2248_v36, %v1115_v45  ;;  %1050 = vst.msk [vmem:[#allocation2 + $0xb0] sm:$0xff] %vm33_vm0, %v985_v42  ;;  %1082 = vst.msk [vmem:[#allocation2 + $0x1b0] sm:$0xff] %vm33_vm0, %v1017_v43  ;;  %v125_v45 = vld [vmem:[#allocation2 + $0xd8] sm:$0xff] }
 0x16a   :  { %v1816_v51 = vpack.c.bf16 %v1281_v41, %v1281_v41  ;;  %v1218_v53 = vadd.f32 %v2248_v36, %v1147_v46  ;;  %v799_v54 = vpop.f32.mrf.mxu0  ;;  %v927_v55 = vpop.f32.mrf.mxu1 }
 0x16b   :  { %1570 = vst.msk [vmem:[%s2638_s3 + $0x4c] sm:$0xf] %vm1550_vm1, %v1784_v50  ;;  %v1250_v56 = vmax.f32 %v1186_v52, 0.0  ;;  %v986_v58 = vadd.f32 %v799_v54, %v121_v44  ;;  %v1018_v59 = vadd.f32 %v927_v55, %v153_v49  ;;  %v157_v50 = vld [vmem:[#allocation2 + $0x1d8] sm:$0xff] }
 0x16c   :  { %1602 = vst.msk [vmem:[%s2638_s3 + $0xcc] sm:$0xf] %vm1550_vm1, %v1816_v51  ;;  %v1282_v57 = vmax.f32 %v1218_v53, 0.0  ;;  %v1116_v61 = vld [vmem:[#allocation2 + $0xa8] sm:$0xff]  ;;  %v801_v63 = vpop.f32.mrf.mxu0  ;;  %v929_v0 = vpop.f32.mrf.mxu1 }
 0x16d   :  { %v1148_v62 = vld [vmem:[#allocation2 + $0x1a8] sm:$0xff]  ;;  %v1785_v2 = vpack.c.bf16 %v1250_v56, %v1250_v56  ;;  %v1187_v4 = vadd.f32 %v2248_v36, %v1116_v61  ;;  %1051 = vst.msk [vmem:[#allocation2 + $0xb8] sm:$0xff] %vm33_vm0, %v986_v58  ;;  %1083 = vst.msk [vmem:[#allocation2 + $0x1b8] sm:$0xff] %vm33_vm0, %v1018_v59  ;;  %v126_v61 = vld [vmem:[#allocation2 + $0xe0] sm:$0xff] }
 0x16e   :  { %v1817_v3 = vpack.c.bf16 %v1282_v57, %v1282_v57  ;;  %v1219_v5 = vadd.f32 %v2248_v36, %v1148_v62  ;;  %v804_v6 = vpop.f32.mrf.mxu0  ;;  %v932_v7 = vpop.f32.mrf.mxu1 }
 0x16f   :  { %1571 = vst.msk [vmem:[%s2638_s3 + $0x50] sm:$0xf] %vm1550_vm1, %v1785_v2  ;;  %v1251_v8 = vmax.f32 %v1187_v4, 0.0  ;;  %v987_v10 = vadd.f32 %v804_v6, %v122_v60  ;;  %v1019_v11 = vadd.f32 %v932_v7, %v154_v1  ;;  %v158_v2 = vld [vmem:[#allocation2 + $0x1e0] sm:$0xff] }
 0x170   :  { %1603 = vst.msk [vmem:[%s2638_s3 + $0xd0] sm:$0xf] %vm1550_vm1, %v1817_v3  ;;  %v1283_v9 = vmax.f32 %v1219_v5, 0.0  ;;  %v1117_v13 = vld [vmem:[#allocation2 + $0xb0] sm:$0xff]  ;;  %v806_v15 = vpop.f32.mrf.mxu0  ;;  %v934_v16 = vpop.f32.mrf.mxu1 }
 0x171   :  { %v1149_v14 = vld [vmem:[#allocation2 + $0x1b0] sm:$0xff]  ;;  %v1786_v18 = vpack.c.bf16 %v1251_v8, %v1251_v8  ;;  %v1188_v20 = vadd.f32 %v2248_v36, %v1117_v13  ;;  %1052 = vst.msk [vmem:[#allocation2 + $0xc0] sm:$0xff] %vm33_vm0, %v987_v10  ;;  %1084 = vst.msk [vmem:[#allocation2 + $0x1c0] sm:$0xff] %vm33_vm0, %v1019_v11 }
 0x172   :  { %v1818_v19 = vpack.c.bf16 %v1283_v9, %v1283_v9  ;;  %v1220_v21 = vadd.f32 %v2248_v36, %v1149_v14  ;;  %v807_v22 = vpop.f32.mrf.mxu0  ;;  %v935_v23 = vpop.f32.mrf.mxu1 }
 0x173   :  { %1572 = vst.msk [vmem:[%s2638_s3 + $0x54] sm:$0xf] %vm1550_vm1, %v1786_v18  ;;  %v1252_v24 = vmax.f32 %v1188_v20, 0.0  ;;  %v988_v26 = vadd.f32 %v807_v22, %v123_v12  ;;  %v1020_v27 = vadd.f32 %v935_v23, %v155_v17  ;;  %v127_v12 = vld [vmem:[#allocation2 + $0xe8] sm:$0xff]  ;;  %v2557_v20 = vld [vmem:[%s2637_s2] ss:$0 sm:$0xff] }
 0x174   :  { %1604 = vst.msk [vmem:[%s2638_s3 + $0xd4] sm:$0xf] %vm1550_vm1, %v1818_v19  ;;  %v1284_v25 = vmax.f32 %v1220_v21, 0.0  ;;  %v1118_v29 = vld [vmem:[#allocation2 + $0xb8] sm:$0xff]  ;;  %v809_v31 = vpop.f32.mrf.mxu0  ;;  %v937_v32 = vpop.f32.mrf.mxu1  ;;  %v159_v17 = vld [vmem:[#allocation2 + $0x1e8] sm:$0xff] }
 0x175   :  { %v1150_v30 = vld [vmem:[#allocation2 + $0x1b8] sm:$0xff]  ;;  %v1787_v34 = vpack.c.bf16 %v1252_v24, %v1252_v24  ;;  %v1189_v37 = vadd.f32 %v2248_v36, %v1118_v29  ;;  %1053 = vst.msk [vmem:[#allocation2 + $0xc8] sm:$0xff] %vm33_vm0, %v988_v26  ;;  %1085 = vst.msk [vmem:[#allocation2 + $0x1c8] sm:$0xff] %vm33_vm0, %v1020_v27  ;;  %v128_v29 = vld [vmem:[#allocation2 + $0xf0] sm:$0xff] }
 0x176   :  { %v1819_v35 = vpack.c.bf16 %v1284_v25, %v1284_v25  ;;  %v1221_v38 = vadd.f32 %v2248_v36, %v1150_v30  ;;  %v812_v39 = vpop.f32.mrf.mxu0  ;;  %v940_v40 = vpop.f32.mrf.mxu1 }
 0x177   :  { %1573 = vst.msk [vmem:[%s2638_s3 + $0x58] sm:$0xf] %vm1550_vm1, %v1787_v34  ;;  %v1253_v41 = vmax.f32 %v1189_v37, 0.0  ;;  %v989_v43 = vadd.f32 %v812_v39, %v124_v28  ;;  %v1021_v44 = vadd.f32 %v940_v40, %v156_v33  ;;  %v160_v34 = vld [vmem:[#allocation2 + $0x1f0] sm:$0xff] }
 0x178   :  { %1605 = vst.msk [vmem:[%s2638_s3 + $0xd8] sm:$0xf] %vm1550_vm1, %v1819_v35  ;;  %v1285_v42 = vmax.f32 %v1221_v38, 0.0  ;;  %v1119_v46 = vld [vmem:[#allocation2 + $0xc0] sm:$0xff]  ;;  %v814_v48 = vpop.f32.mrf.mxu0  ;;  %v942_v49 = vpop.f32.mrf.mxu1 }
 0x179   :  { %v1151_v47 = vld [vmem:[#allocation2 + $0x1c0] sm:$0xff]  ;;  %v1788_v51 = vpack.c.bf16 %v1253_v41, %v1253_v41  ;;  %v1190_v53 = vadd.f32 %v2248_v36, %v1119_v46  ;;  %1054 = vst.msk [vmem:[#allocation2 + $0xd0] sm:$0xff] %vm33_vm0, %v989_v43  ;;  %1086 = vst.msk [vmem:[#allocation2 + $0x1d0] sm:$0xff] %vm33_vm0, %v1021_v44  ;;  %v129_v46 = vld [vmem:[#allocation2 + $0xf8] sm:$0xff] }
 0x17a   :  { %v1820_v52 = vpack.c.bf16 %v1285_v42, %v1285_v42  ;;  %v1222_v54 = vadd.f32 %v2248_v36, %v1151_v47  ;;  %v815_v55 = vpop.f32.mrf.mxu0  ;;  %v943_v56 = vpop.f32.mrf.mxu1 }
 0x17b   :  { %1574 = vst.msk [vmem:[%s2638_s3 + $0x5c] sm:$0xf] %vm1550_vm1, %v1788_v51  ;;  %v1254_v57 = vmax.f32 %v1190_v53, 0.0  ;;  %v990_v59 = vadd.f32 %v815_v55, %v125_v45  ;;  %v1022_v60 = vadd.f32 %v943_v56, %v157_v50  ;;  %v161_v51 = vld [vmem:[#allocation2 + $0x1f8] sm:$0xff] }
 0x17c   :  { %1606 = vst.msk [vmem:[%s2638_s3 + $0xdc] sm:$0xf] %vm1550_vm1, %v1820_v52  ;;  %v1286_v58 = vmax.f32 %v1222_v54, 0.0  ;;  %v1120_v62 = vld [vmem:[#allocation2 + $0xc8] sm:$0xff]  ;;  %v817_v0 = vpop.f32.mrf.mxu0  ;;  %v945_v1 = vpop.f32.mrf.mxu1 }
 0x17d   :  { %v1152_v63 = vld [vmem:[#allocation2 + $0x1c8] sm:$0xff]  ;;  %v1789_v3 = vpack.c.bf16 %v1254_v57, %v1254_v57  ;;  %v1191_v5 = vadd.f32 %v2248_v36, %v1120_v62  ;;  %1055 = vst.msk [vmem:[#allocation2 + $0xd8] sm:$0xff] %vm33_vm0, %v990_v59  ;;  %1087 = vst.msk [vmem:[#allocation2 + $0x1d8] sm:$0xff] %vm33_vm0, %v1022_v60 }
 0x17e   :  { %v1821_v4 = vpack.c.bf16 %v1286_v58, %v1286_v58  ;;  %v1223_v6 = vadd.f32 %v2248_v36, %v1152_v63  ;;  %v820_v7 = vpop.f32.mrf.mxu0  ;;  %v948_v8 = vpop.f32.mrf.mxu1 }
 0x17f   :  { %1575 = vst.msk [vmem:[%s2638_s3 + $0x60] sm:$0xf] %vm1550_vm1, %v1789_v3  ;;  %v1255_v9 = vmax.f32 %v1191_v5, 0.0  ;;  %v991_v11 = vadd.f32 %v820_v7, %v126_v61  ;;  %v1023_v36 = vadd.f32 %v948_v8, %v158_v2 }
 0x180   :  { %1607 = vst.msk [vmem:[%s2638_s3 + $0xe0] sm:$0xf] %vm1550_vm1, %v1821_v4  ;;  %v1287_v10 = vmax.f32 %v1223_v6, 0.0  ;;  %v1121_v13 = vld [vmem:[#allocation2 + $0xd0] sm:$0xff]  ;;  %v822_v15 = vpop.f32.mrf.mxu0  ;;  %v950_v16 = vpop.f32.mrf.mxu1 }
 0x181   :  { %v1153_v14 = vld [vmem:[#allocation2 + $0x1d0] sm:$0xff]  ;;  %v1790_v18 = vpack.c.bf16 %v1255_v9, %v1255_v9  ;;  %v1192_v21 = vadd.f32 %v2557_v20, %v1121_v13  ;;  %1056 = vst.msk [vmem:[#allocation2 + $0xe0] sm:$0xff] %vm33_vm0, %v991_v11  ;;  %1088 = vst.msk [vmem:[#allocation2 + $0x1e0] sm:$0xff] %vm33_vm0, %v1023_v36 }
 0x182   :  { %v1822_v19 = vpack.c.bf16 %v1287_v10, %v1287_v10  ;;  %v1224_v22 = vadd.f32 %v2557_v20, %v1153_v14  ;;  %v823_v23 = vpop.f32.mrf.mxu0  ;;  %v951_v24 = vpop.f32.mrf.mxu1 }
 0x183   :  { %1576 = vst.msk [vmem:[%s2638_s3 + $0x64] sm:$0xf] %vm1550_vm1, %v1790_v18  ;;  %v1256_v25 = vmax.f32 %v1192_v21, 0.0  ;;  %v992_v27 = vadd.f32 %v823_v23, %v127_v12  ;;  %v1024_v28 = vadd.f32 %v951_v24, %v159_v17 }
 0x184   :  { %1608 = vst.msk [vmem:[%s2638_s3 + $0xe4] sm:$0xf] %vm1550_vm1, %v1822_v19  ;;  %v1288_v26 = vmax.f32 %v1224_v22, 0.0  ;;  %v1122_v30 = vld [vmem:[#allocation2 + $0xd8] sm:$0xff]  ;;  %v825_v32 = vpop.f32.mrf.mxu0  ;;  %v953_v33 = vpop.f32.mrf.mxu1 }
 0x185   :  { %v1154_v31 = vld [vmem:[#allocation2 + $0x1d8] sm:$0xff]  ;;  %v1791_v35 = vpack.c.bf16 %v1256_v25, %v1256_v25  ;;  %v1193_v38 = vadd.f32 %v2557_v20, %v1122_v30  ;;  %1057 = vst.msk [vmem:[#allocation2 + $0xe8] sm:$0xff] %vm33_vm0, %v992_v27  ;;  %1089 = vst.msk [vmem:[#allocation2 + $0x1e8] sm:$0xff] %vm33_vm0, %v1024_v28 }
 0x186   :  { %v1823_v37 = vpack.c.bf16 %v1288_v26, %v1288_v26  ;;  %v1225_v39 = vadd.f32 %v2557_v20, %v1154_v31  ;;  %v828_v40 = vpop.f32.mrf.mxu0  ;;  %v956_v41 = vpop.f32.mrf.mxu1 }
 0x187   :  { %1577 = vst.msk [vmem:[%s2638_s3 + $0x68] sm:$0xf] %vm1550_vm1, %v1791_v35  ;;  %v1257_v42 = vmax.f32 %v1193_v38, 0.0  ;;  %v993_v44 = vadd.f32 %v828_v40, %v128_v29  ;;  %v1025_v45 = vadd.f32 %v956_v41, %v160_v34 }
 0x188   :  { %1609 = vst.msk [vmem:[%s2638_s3 + $0xe8] sm:$0xf] %vm1550_vm1, %v1823_v37  ;;  %v1289_v43 = vmax.f32 %v1225_v39, 0.0  ;;  %v1123_v47 = vld [vmem:[#allocation2 + $0xe0] sm:$0xff]  ;;  %v830_v49 = vpop.f32.mrf.mxu0  ;;  %v958_v50 = vpop.f32.mrf.mxu1 }
 0x189   :  { %v1155_v48 = vld [vmem:[#allocation2 + $0x1e0] sm:$0xff]  ;;  %v1792_v52 = vpack.c.bf16 %v1257_v42, %v1257_v42  ;;  %v1194_v54 = vadd.f32 %v2557_v20, %v1123_v47  ;;  %1058 = vst.msk [vmem:[#allocation2 + $0xf0] sm:$0xff] %vm33_vm0, %v993_v44  ;;  %1090 = vst.msk [vmem:[#allocation2 + $0x1f0] sm:$0xff] %vm33_vm0, %v1025_v45 }
 0x18a   :  { %v1824_v53 = vpack.c.bf16 %v1289_v43, %v1289_v43  ;;  %v1226_v55 = vadd.f32 %v2557_v20, %v1155_v48  ;;  %v831_v56 = vpop.f32.mrf.mxu0  ;;  %v959_v57 = vpop.f32.mrf.mxu1 }
 0x18b   :  { %1578 = vst.msk [vmem:[%s2638_s3 + $0x6c] sm:$0xf] %vm1550_vm1, %v1792_v52  ;;  %v1258_v58 = vmax.f32 %v1194_v54, 0.0  ;;  %v994_v60 = vadd.f32 %v831_v56, %v129_v46  ;;  %v1026_v61 = vadd.f32 %v959_v57, %v161_v51 }
 0x18c   :  { %1610 = vst.msk [vmem:[%s2638_s3 + $0xec] sm:$0xf] %vm1550_vm1, %v1824_v53  ;;  %v1290_v59 = vmax.f32 %v1226_v55, 0.0  ;;  %v1124_v62 = vld [vmem:[#allocation2 + $0xe8] sm:$0xff]  ;;  %v833_v0 = vpop.f32.mrf.mxu0  ;;  %v961_v1 = vpop.f32.mrf.mxu1 }
 0x18d   :  { %v1156_v63 = vld [vmem:[#allocation2 + $0x1e8] sm:$0xff]  ;;  %v1793_v2 = vpack.c.bf16 %v1258_v58, %v1258_v58  ;;  %v1195_v4 = vadd.f32 %v2557_v20, %v1124_v62  ;;  %1059 = vst.msk [vmem:[#allocation2 + $0xf8] sm:$0xff] %vm33_vm0, %v994_v60  ;;  %1091 = vst.msk [vmem:[#allocation2 + $0x1f8] sm:$0xff] %vm33_vm0, %v1026_v61 }
 0x18e   :  { %v1825_v3 = vpack.c.bf16 %v1290_v59, %v1290_v59  ;;  %v1227_v5 = vadd.f32 %v2557_v20, %v1156_v63 }
 0x18f   :  { %1579 = vst.msk [vmem:[%s2638_s3 + $0x70] sm:$0xf] %vm1550_vm1, %v1793_v2  ;;  %v1259_v6 = vmax.f32 %v1195_v4, 0.0 }
 0x190   :  { %1611 = vst.msk [vmem:[%s2638_s3 + $0xf0] sm:$0xf] %vm1550_vm1, %v1825_v3  ;;  %v1291_v7 = vmax.f32 %v1227_v5, 0.0  ;;  %v1125_v8 = vld [vmem:[#allocation2 + $0xf0] sm:$0xff] }
 0x191   :  { %v1157_v9 = vld [vmem:[#allocation2 + $0x1f0] sm:$0xff]  ;;  %v1794_v10 = vpack.c.bf16 %v1259_v6, %v1259_v6  ;;  %v1196_v36 = vadd.f32 %v2557_v20, %v1125_v8 }
 0x192   :  { %v1826_v11 = vpack.c.bf16 %v1291_v7, %v1291_v7  ;;  %v1228_v12 = vadd.f32 %v2557_v20, %v1157_v9 }
 0x193   :  { %1580 = vst.msk [vmem:[%s2638_s3 + $0x74] sm:$0xf] %vm1550_vm1, %v1794_v10  ;;  %v1260_v13 = vmax.f32 %v1196_v36, 0.0 }
 0x194   :  { %1612 = vst.msk [vmem:[%s2638_s3 + $0xf4] sm:$0xf] %vm1550_vm1, %v1826_v11  ;;  %v1292_v14 = vmax.f32 %v1228_v12, 0.0  ;;  %v1126_v15 = vld [vmem:[#allocation2 + $0xf8] sm:$0xff] }
 0x195   :  { %v1158_v16 = vld [vmem:[#allocation2 + $0x1f8] sm:$0xff]  ;;  %v1795_v17 = vpack.c.bf16 %v1260_v13, %v1260_v13  ;;  %v1197_v19 = vadd.f32 %v2557_v20, %v1126_v15 }
 0x196   :  { %v1827_v18 = vpack.c.bf16 %v1292_v14, %v1292_v14  ;;  %v1229_v21 = vadd.f32 %v2557_v20, %v1158_v16 }
 0x197   :  { %1581 = vst.msk [vmem:[%s2638_s3 + $0x78] sm:$0xf] %vm1550_vm1, %v1795_v17  ;;  %v1261_v22 = vmax.f32 %v1197_v19, 0.0 }
 0x198   :  { %1613 = vst.msk [vmem:[%s2638_s3 + $0xf8] sm:$0xf] %vm1550_vm1, %v1827_v18  ;;  %v1293_v23 = vmax.f32 %v1229_v21, 0.0 }
 0x199   :  { %v1796_v24 = vpack.c.bf16 %v1261_v22, %v1261_v22 }
 0x19a   :  { %v1828_v25 = vpack.c.bf16 %v1293_v23, %v1293_v23 }
 0x19b   :  { %1582 = vst.msk [vmem:[%s2638_s3 + $0x7c] sm:$0xf] %vm1550_vm1, %v1796_v24 }
 0x19c   :  { %1614 = vst.msk [vmem:[%s2638_s3 + $0xfc] sm:$0xf] %vm1550_vm1, %v1828_v25 }
 0x19d   :  { %1619 = vsyncpa [#allocation4], 1 }

</bundles_post_ra>
